<compile_context>
chip_gen: v7x
topology: tpu7x:2x2x1
jax: 0.10.0
libtpu: 0.0.40
codegen_flags: <defaults>
</compile_context>

<pallas_src>
import functools

import jax
import jax.numpy as jnp
from jax import lax
from jax.experimental import pallas as pl
from jax.experimental.pallas import tpu as pltpu

# Hyperparameters (match LSTMClassifier defaults except num_layers=2, see NOTE).
NUM_EMBEDDINGS = 5084
EMBEDDING_DIM = 64
HIDDEN_SIZE = 32
NUM_LAYERS = 2
FC1_OUT = 128
OUT_FEATURES = 5
CLASS_PAD = 128          # lane-dense padded class axis for the output store


def _round_up(x, m):
    return ((x + m - 1) // m) * m


def lstm_classifier_kernel(n_sub,
                           emb_ref,
                           wih0_ref, whh0_ref, b0_ref,
                           wih1_ref, whh1_ref, b1_ref,
                           wfc1_ref, bfc1_ref,
                           wfc2_ref, bfc2_ref,
                           out_ref,
                           xproj_ref, h0_ref):
    """2-layer LSTM (layer-major, hoisted input projections) + MLP head + softmax.

    n_sub (static): number of independent batch sub-tiles interleaved per step.
    """
    T, TB, E = emb_ref.shape
    H = HIDDEN_SIZE
    G = 4 * H
    SUB = TB // n_sub
    bf16 = jnp.bfloat16

    # ---- Hoist all weight / bias loads out of the recurrence (loop-invariant) ----
    wih0 = wih0_ref[...]          # (E, 4H)      bf16 (i/f/o cols pre-scaled by 0.5)
    whh0 = whh0_ref[...]          # (H, 4H)      bf16 (i/f/o cols pre-scaled by 0.5)
    b0 = b0_ref[...]              # (1, 4H)      f32  (b_ih + b_hh, pre-scaled)
    wih1 = wih1_ref[...]          # (H, 4H)      bf16
    whh1 = whh1_ref[...]          # (H, 4H)      bf16
    b1 = b1_ref[...]              # (1, 4H)      f32
    wfc1 = wfc1_ref[...]          # (H, 128)     bf16
    bfc1 = bfc1_ref[...]          # (1, 128)     f32
    wfc2 = wfc2_ref[...]          # (128, CPAD)  bf16 (pad cols zero)
    bfc2 = bfc2_ref[...]          # (1, CPAD)    f32  (pad cols -1e30)

    def gates_and_state(g, c):
        # Pre-activations of the i/f/o gates carry a folded 0.5x scale, so ONE
        # full-width tanh gives tanh() for the cell gate and 2*sigmoid()-1 for
        # i/f/o; sigmoid is recovered on the VPU as 0.5*t + 0.5.
        t = jnp.tanh(g)                           # (SUB, 4H) f32, single EUP pass
        i = 0.5 * t[:, 0 * H:1 * H] + 0.5
        f = 0.5 * t[:, 1 * H:2 * H] + 0.5
        gg = t[:, 2 * H:3 * H]
        o = 0.5 * t[:, 3 * H:4 * H] + 0.5
        c_new = f * c + i * gg
        h_new = o * jnp.tanh(c_new)               # quarter-width EUP pass
        return h_new, c_new

    zeros = tuple((jnp.zeros((SUB, H), jnp.float32),
                   jnp.zeros((SUB, H), jnp.float32)) for _ in range(n_sub))

    def run_layer(whh, store_h):
        def step(t, carry):
            g_all = xproj_ref[t]                  # (TB, 4H) f32
            new_carry = []
            hs = []
            for si in range(n_sub):               # independent chains, interleaved
                h, c = carry[si]
                lo = si * SUB
                g = g_all[lo:lo + SUB, :] + jnp.dot(
                    h.astype(bf16), whh, preferred_element_type=jnp.float32)
                h_new, c_new = gates_and_state(g, c)
                hs.append(h_new)
                new_carry.append((h_new, c_new))
            if store_h:
                h_cat = hs[0] if n_sub == 1 else jnp.concatenate(hs, axis=0)
                h0_ref[t] = h_cat.astype(bf16)     # bf16 scratch (matmul operand only)
            return tuple(new_carry)
        return lax.fori_loop(0, T, step, zeros, unroll=True)

    # ---- Layer 0: batched input projection (single MXU-friendly matmul) ----
    x_all = emb_ref[...].reshape(T * TB, E)                          # bf16
    xproj_ref[...] = (jnp.dot(x_all, wih0,
                              preferred_element_type=jnp.float32)
                      + b0).reshape(T, TB, G)
    run_layer(whh0, store_h=True)

    # ---- Layer 1: batched input projection over all layer-0 hiddens ----
    h0_all = h0_ref[...].reshape(T * TB, H)                          # bf16
    xproj_ref[...] = (jnp.dot(h0_all, wih1,
                              preferred_element_type=jnp.float32)
                      + b1).reshape(T, TB, G)
    final = run_layer(whh1, store_h=False)
    h1 = (final[0][0] if n_sub == 1
          else jnp.concatenate([hc[0] for hc in final], axis=0))     # (TB, H) f32

    # ---- MLP head: fc1 -> ReLU -> fc2 -> softmax (lane-dense, padded classes) ----
    a1 = jnp.maximum(
        jnp.dot(h1.astype(bf16), wfc1, preferred_element_type=jnp.float32) + bfc1,
        0.0)
    logits = (jnp.dot(a1.astype(bf16), wfc2, preferred_element_type=jnp.float32)
              + bfc2)                                                # pad cols -> -1e30
    m = jnp.max(logits, axis=-1, keepdims=True)
    e = jnp.exp(logits - m)                                          # pad cols -> 0
    denom = jnp.sum(e, axis=-1, keepdims=True)
    out_ref[...] = e / denom                                         # exact (once/tile)


def init_params(key):
    """Deterministic parameter init with PyTorch-like shapes."""
    H, E = HIDDEN_SIZE, EMBEDDING_DIM
    ks = jax.random.split(key, 16)
    s_lstm = 1.0 / (H ** 0.5)
    s_fc1 = 1.0 / (H ** 0.5)
    s_fc2 = 1.0 / (FC1_OUT ** 0.5)

    def u(k, shape, s):
        return jax.random.uniform(k, shape, jnp.float32, -s, s)

    return {
        "embedding": jax.random.normal(ks[0], (NUM_EMBEDDINGS, E), jnp.float32),
        # LSTM layer 0
        "w_ih_l0": u(ks[1], (4 * H, E), s_lstm),
        "w_hh_l0": u(ks[2], (4 * H, H), s_lstm),
        "b_ih_l0": u(ks[3], (4 * H,), s_lstm),
        "b_hh_l0": u(ks[4], (4 * H,), s_lstm),
        # LSTM layer 1
        "w_ih_l1": u(ks[5], (4 * H, H), s_lstm),
        "w_hh_l1": u(ks[6], (4 * H, H), s_lstm),
        "b_ih_l1": u(ks[7], (4 * H,), s_lstm),
        "b_hh_l1": u(ks[8], (4 * H,), s_lstm),
        # fc1 / fc2 (PyTorch Linear: weight is (out, in))
        "fc1_w": u(ks[9], (FC1_OUT, H), s_fc1),
        "fc1_b": u(ks[10], (FC1_OUT,), s_fc1),
        "fc2_w": u(ks[11], (OUT_FEATURES, FC1_OUT), s_fc2),
        "fc2_b": u(ks[12], (OUT_FEATURES,), s_fc2),
    }


def _choose_batch_tile(B):
    """Pick (TB, B_pad, n_btiles, n_sub) per the perf review.

    * B <= 8: one 8-row tile (sublane aligned).
    * 8 < B <= 256: two balanced tiles -> both v7x TensorCores get work.
    * B > 256: 128-row tiles (big MXU fill, lane/sublane dense).
    n_sub = 2 independent (h,c) chains per tile when the tile is >= 16 rows.
    """
    B8 = _round_up(max(B, 1), 8)
    if B8 <= 8:
        TB = 8
    elif B8 <= 256:
        TB = _round_up(B8, 16) // 2
    else:
        TB = 128
    B_pad = _round_up(B8, TB)
    n_btiles = B_pad // TB
    n_sub = 2 if TB >= 16 else 1
    return TB, B_pad, n_btiles, n_sub


def lstm_classifier_forward(X, params):
    """X: (batch, seq) int32 token ids -> (batch, OUT_FEATURES) softmax probs."""
    B, T = X.shape
    H, E = HIDDEN_SIZE, EMBEDDING_DIM
    G = 4 * H
    C = OUT_FEATURES
    bf16 = jnp.bfloat16

    # Embedding gather directly in time-major order: (T, B, E), bf16.
    emb = jnp.take(params["embedding"].astype(bf16), X.T, axis=0)

    TB, B_pad, n_btiles, n_sub = _choose_batch_tile(B)
    if B_pad != B:
        emb = jnp.pad(emb, ((0, 0), (0, B_pad - B), (0, 0)))

    # Gate pre-scale: 0.5 on i/f/o columns (PyTorch gate order i, f, g, o) so a
    # single in-kernel tanh serves all four gates.
    gate_scale = jnp.concatenate([
        jnp.full((H,), 0.5, jnp.float32),
        jnp.full((H,), 0.5, jnp.float32),
        jnp.ones((H,), jnp.float32),
        jnp.full((H,), 0.5, jnp.float32),
    ])

    def lstm_weights(wi, wh, bi, bh):
        wih = (wi.T * gate_scale[None, :]).astype(bf16)              # (in, 4H)
        whh = (wh.T * gate_scale[None, :]).astype(bf16)              # (H, 4H)
        b = ((bi + bh) * gate_scale)[None, :].astype(jnp.float32)    # (1, 4H)
        return wih, whh, b

    wih0, whh0, b0 = lstm_weights(params["w_ih_l0"], params["w_hh_l0"],
                                  params["b_ih_l0"], params["b_hh_l0"])
    wih1, whh1, b1 = lstm_weights(params["w_ih_l1"], params["w_hh_l1"],
                                  params["b_ih_l1"], params["b_hh_l1"])

    wfc1 = params["fc1_w"].T.astype(bf16)                            # (H, 128)
    bfc1 = params["fc1_b"][None, :].astype(jnp.float32)              # (1, 128)

    # Lane-dense output head: pad fc2 to CLASS_PAD columns.  Padded columns get
    # zero weight and -1e30 bias so exp()==0 and the softmax over the first C
    # columns is exact (logits path stays f32, so -1e30 is safe).
    wfc2 = jnp.zeros((FC1_OUT, CLASS_PAD), bf16)
    wfc2 = wfc2.at[:, :C].set(params["fc2_w"].T.astype(bf16))
    bfc2 = jnp.full((1, CLASS_PAD), -1e30, jnp.float32)
    bfc2 = bfc2.at[0, :C].set(params["fc2_b"].astype(jnp.float32))

    in_specs = [
        pl.BlockSpec((T, TB, E), lambda b: (0, b, 0)),        # emb (time-major)
        pl.BlockSpec((E, G), lambda b: (0, 0)),               # wih0
        pl.BlockSpec((H, G), lambda b: (0, 0)),               # whh0
        pl.BlockSpec((1, G), lambda b: (0, 0)),               # b0
        pl.BlockSpec((H, G), lambda b: (0, 0)),               # wih1
        pl.BlockSpec((H, G), lambda b: (0, 0)),               # whh1
        pl.BlockSpec((1, G), lambda b: (0, 0)),               # b1
        pl.BlockSpec((H, FC1_OUT), lambda b: (0, 0)),         # wfc1
        pl.BlockSpec((1, FC1_OUT), lambda b: (0, 0)),         # bfc1
        pl.BlockSpec((FC1_OUT, CLASS_PAD), lambda b: (0, 0)), # wfc2 (padded)
        pl.BlockSpec((1, CLASS_PAD), lambda b: (0, 0)),       # bfc2 (padded)
    ]
    out_spec = pl.BlockSpec((TB, CLASS_PAD), lambda b: (b, 0))

    scratch_shapes = [
        pltpu.VMEM((T, TB, G), jnp.float32),    # batched gate pre-activations
        pltpu.VMEM((T, TB, H), jnp.bfloat16),   # all layer-0 hiddens (bf16)
    ]

    # ---- VMEM budget: size the scoped limit from actual blocks, cap at 75% of
    # the chip's VMEM (64 MiB on v7x, 128 MiB on v5e/v6e). ----
    weight_bytes = ((E * G + 3 * H * G + H * FC1_OUT + FC1_OUT * CLASS_PAD) * 2
                    + (2 * G + FC1_OUT + CLASS_PAD) * 4)
    block_bytes = T * TB * E * 2 + weight_bytes + TB * CLASS_PAD * 4
    scratch_bytes = T * TB * G * 4 + T * TB * H * 2
    vmem_need = 2 * block_bytes + scratch_bytes          # inputs/outputs double-buffered
    try:
        vmem_cap = int(pltpu.get_tpu_info().vmem_capacity_bytes)
    except Exception:
        vmem_cap = 64 * 1024 * 1024
    vmem_limit = int(min(max(32 * 1024 * 1024, 2 * vmem_need),
                         (vmem_cap * 3) // 4))

    # Advisory cost estimate so XLA schedules the surrounding gather correctly.
    flops = (2 * T * B_pad * E * G          # layer-0 input projection
             + 2 * T * B_pad * H * G        # layer-0 recurrent projection
             + 2 * T * B_pad * H * G        # layer-1 input projection
             + 2 * T * B_pad * H * G        # layer-1 recurrent projection
             + 2 * B_pad * H * FC1_OUT
             + 2 * B_pad * FC1_OUT * CLASS_PAD)
    transcendentals = 2 * T * B_pad * (G + H) + B_pad * CLASS_PAD
    bytes_accessed = (emb.size * 2
                      + (wih0.size + whh0.size + wih1.size + whh1.size
                         + wfc1.size + wfc2.size) * 2
                      + (b0.size + b1.size + bfc1.size + bfc2.size) * 4
                      + B_pad * CLASS_PAD * 4)

    out_full = pl.pallas_call(
        functools.partial(lstm_classifier_kernel, n_sub),
        out_shape=jax.ShapeDtypeStruct((B_pad, CLASS_PAD), jnp.float32),
        grid_spec=pltpu.PrefetchScalarGridSpec(
            num_scalar_prefetch=0,
            grid=(n_btiles,),
            in_specs=in_specs,
            out_specs=out_spec,
            scratch_shapes=scratch_shapes),
        compiler_params=pltpu.CompilerParams(
            dimension_semantics=("parallel",),
            vmem_limit_bytes=vmem_limit),
        cost_estimate=pl.CostEstimate(flops=int(flops),
                                      transcendentals=int(transcendentals),
                                      bytes_accessed=int(bytes_accessed)),
    )(emb, wih0, whh0, b0, wih1, whh1, b1, wfc1, bfc1, wfc2, bfc2)

    return out_full[:B, :C]


def reference_forward(X, params):
    """Pure-JAX f32 reference matching the PyTorch module (num_layers=2)."""
    emb = params["embedding"][X]                                     # (B, T, E)

    def lstm_layer(x, w_ih, w_hh, b_ih, b_hh):
        Bv = x.shape[0]
        Hh = w_hh.shape[1]

        def step(carry, xt):
            h, c = carry
            g = xt @ w_ih.T + b_ih + h @ w_hh.T + b_hh
            i, f, gg, o = jnp.split(g, 4, axis=-1)
            i, f, o = jax.nn.sigmoid(i), jax.nn.sigmoid(f), jax.nn.sigmoid(o)
            gg = jnp.tanh(gg)
            c = f * c + i * gg
            h = o * jnp.tanh(c)
            return (h, c), h

        init = (jnp.zeros((Bv, Hh), jnp.float32), jnp.zeros((Bv, Hh), jnp.float32))
        (h, _), hs = lax.scan(step, init, jnp.swapaxes(x, 0, 1))
        return jnp.swapaxes(hs, 0, 1), h

    out0, _ = lstm_layer(emb, params["w_ih_l0"], params["w_hh_l0"],
                         params["b_ih_l0"], params["b_hh_l0"])
    _, h1 = lstm_layer(out0, params["w_ih_l1"], params["w_hh_l1"],
                       params["b_ih_l1"], params["b_hh_l1"])
    a1 = jnp.maximum(h1 @ params["fc1_w"].T + params["fc1_b"], 0.0)
    logits = a1 @ params["fc2_w"].T + params["fc2_b"]
    return jax.nn.softmax(logits, axis=-1)


if __name__ == "__main__":
    key = jax.random.PRNGKey(0)
    pkey, xkey = jax.random.split(key)
    params = init_params(pkey)

    B, T = 2, 8
    X = jax.random.randint(xkey, (B, T), 0, NUM_EMBEDDINGS, dtype=jnp.int32)

    out = lstm_classifier_forward(X, params)
    out = jax.block_until_ready(out)

    assert out.shape == (B, OUT_FEATURES)
    # softmax rows sum to 1 (exact divide in-kernel)
    assert bool(jnp.all(jnp.abs(jnp.sum(out, axis=-1) - 1.0) < 1e-3))
    # loose parity vs f32 reference (kernel uses bf16 matmul operands)
    ref = reference_forward(X, params)
    assert bool(jnp.max(jnp.abs(out - ref)) < 5e-2)
    print("KERNEL_OK")
</pallas_src>

<mosaic_0001>
module attributes {stable_mosaic.version = 11 : i64} {
  func.func @lstm_classifier_kernel(%arg0: i32, %arg1: memref<8x8x64xbf16, #tpu.memory_space<vmem>>, %arg2: memref<64x128xbf16, #tpu.memory_space<vmem>>, %arg3: memref<32x128xbf16, #tpu.memory_space<vmem>>, %arg4: memref<1x128xf32, #tpu.memory_space<vmem>>, %arg5: memref<32x128xbf16, #tpu.memory_space<vmem>>, %arg6: memref<32x128xbf16, #tpu.memory_space<vmem>>, %arg7: memref<1x128xf32, #tpu.memory_space<vmem>>, %arg8: memref<32x128xbf16, #tpu.memory_space<vmem>>, %arg9: memref<1x128xf32, #tpu.memory_space<vmem>>, %arg10: memref<128x128xbf16, #tpu.memory_space<vmem>>, %arg11: memref<1x128xf32, #tpu.memory_space<vmem>>, %arg12: memref<8x128xf32, #tpu.memory_space<vmem>>, %arg13: memref<8x8x128xf32, #tpu.memory_space<vmem>>, %arg14: memref<8x8x32xbf16, #tpu.memory_space<vmem>>) attributes {dimension_semantics = [#tpu.dimension_semantics<parallel>], iteration_bounds = array<i64: 1>, scalar_prefetch = 0 : i64, scratch_operands = 2 : i64, tpu.core_type = #tpu.core_type<tc>, window_params = [{transform_indices = @transform_0, window_bounds = array<i64: 8, 8, 64>}, {pipeline_mode = #tpu.pipeline_mode<synchronous>, transform_indices = @transform_1, window_bounds = array<i64: 64, 128>}, {pipeline_mode = #tpu.pipeline_mode<synchronous>, transform_indices = @transform_2, window_bounds = array<i64: 32, 128>}, {pipeline_mode = #tpu.pipeline_mode<synchronous>, transform_indices = @transform_3, window_bounds = array<i64: 1, 128>}, {pipeline_mode = #tpu.pipeline_mode<synchronous>, transform_indices = @transform_4, window_bounds = array<i64: 32, 128>}, {pipeline_mode = #tpu.pipeline_mode<synchronous>, transform_indices = @transform_5, window_bounds = array<i64: 32, 128>}, {pipeline_mode = #tpu.pipeline_mode<synchronous>, transform_indices = @transform_6, window_bounds = array<i64: 1, 128>}, {pipeline_mode = #tpu.pipeline_mode<synchronous>, transform_indices = @transform_7, window_bounds = array<i64: 32, 128>}, {pipeline_mode = #tpu.pipeline_mode<synchronous>, transform_indices = @transform_8, window_bounds = array<i64: 1, 128>}, {pipeline_mode = #tpu.pipeline_mode<synchronous>, transform_indices = @transform_9, window_bounds = array<i64: 128, 128>}, {pipeline_mode = #tpu.pipeline_mode<synchronous>, transform_indices = @transform_10, window_bounds = array<i64: 1, 128>}, {transform_indices = @transform_11, window_bounds = array<i64: 8, 128>}]} {
    %c0 = arith.constant 0 : index
    %c0_0 = arith.constant 0 : index
    %0 = vector.load %arg2[%c0, %c0_0] : memref<64x128xbf16, #tpu.memory_space<vmem>>, vector<64x128xbf16>
    %c0_1 = arith.constant 0 : index
    %c0_2 = arith.constant 0 : index
    %1 = vector.load %arg3[%c0_1, %c0_2] : memref<32x128xbf16, #tpu.memory_space<vmem>>, vector<32x128xbf16>
    %c0_3 = arith.constant 0 : index
    %c0_4 = arith.constant 0 : index
    %2 = vector.load %arg4[%c0_3, %c0_4] : memref<1x128xf32, #tpu.memory_space<vmem>>, vector<1x128xf32>
    %c0_5 = arith.constant 0 : index
    %c0_6 = arith.constant 0 : index
    %3 = vector.load %arg5[%c0_5, %c0_6] : memref<32x128xbf16, #tpu.memory_space<vmem>>, vector<32x128xbf16>
    %c0_7 = arith.constant 0 : index
    %c0_8 = arith.constant 0 : index
    %4 = vector.load %arg6[%c0_7, %c0_8] : memref<32x128xbf16, #tpu.memory_space<vmem>>, vector<32x128xbf16>
    %c0_9 = arith.constant 0 : index
    %c0_10 = arith.constant 0 : index
    %5 = vector.load %arg7[%c0_9, %c0_10] : memref<1x128xf32, #tpu.memory_space<vmem>>, vector<1x128xf32>
    %c0_11 = arith.constant 0 : index
    %c0_12 = arith.constant 0 : index
    %6 = vector.load %arg8[%c0_11, %c0_12] : memref<32x128xbf16, #tpu.memory_space<vmem>>, vector<32x128xbf16>
    %c0_13 = arith.constant 0 : index
    %c0_14 = arith.constant 0 : index
    %7 = vector.load %arg9[%c0_13, %c0_14] : memref<1x128xf32, #tpu.memory_space<vmem>>, vector<1x128xf32>
    %c0_15 = arith.constant 0 : index
    %c0_16 = arith.constant 0 : index
    %8 = vector.load %arg10[%c0_15, %c0_16] : memref<128x128xbf16, #tpu.memory_space<vmem>>, vector<128x128xbf16>
    %c0_17 = arith.constant 0 : index
    %c0_18 = arith.constant 0 : index
    %9 = vector.load %arg11[%c0_17, %c0_18] : memref<1x128xf32, #tpu.memory_space<vmem>>, vector<1x128xf32>
    %cst = arith.constant 0.000000e+00 : f32
    %10 = vector.broadcast %cst : f32 to vector<8x32xf32>
    %cst_19 = arith.constant 0.000000e+00 : f32
    %11 = vector.broadcast %cst_19 : f32 to vector<8x32xf32>
    %c0_20 = arith.constant 0 : index
    %c0_21 = arith.constant 0 : index
    %c0_22 = arith.constant 0 : index
    %12 = vector.load %arg1[%c0_20, %c0_21, %c0_22] : memref<8x8x64xbf16, #tpu.memory_space<vmem>>, vector<8x8x64xbf16>
    %13 = vector.shape_cast %12 : vector<8x8x64xbf16> to vector<64x64xbf16>
    %cst_23 = arith.constant dense<0.000000e+00> : vector<64x128xf32>
    %14 = tpu.matmul %13, %0, %cst_23 {dimension_numbers = #tpu.dot_dimension_numbers<[1], [0], [0], [1], [0, 0, 1, 1], [], []>} : vector<64x64xbf16>, vector<64x128xbf16>, vector<64x128xf32> -> vector<64x128xf32>
    %15 = vector.broadcast %2 : vector<1x128xf32> to vector<64x128xf32>
    %16 = arith.addf %14, %15 : vector<64x128xf32>
    %17 = vector.shape_cast %16 : vector<64x128xf32> to vector<8x8x128xf32>
    %c0_24 = arith.constant 0 : index
    %c0_25 = arith.constant 0 : index
    %c0_26 = arith.constant 0 : index
    %18 = vector.load %arg13[%c0_24, %c0_25, %c0_26] : memref<8x8x128xf32, #tpu.memory_space<vmem>>, vector<8x8x128xf32>
    tpu.vector_store %arg13[%c0_24, %c0_25, %c0_26], %17 {strides = array<i32>} : memref<8x8x128xf32, #tpu.memory_space<vmem>>, vector<8x8x128xf32>,
    %c0_i32 = arith.constant 0 : i32
    %19 = arith.index_cast %c0_i32 : i32 to index
    %c0_27 = arith.constant 0 : index
    %c0_28 = arith.constant 0 : index
    %20 = vector.load %arg13[%19, %c0_27, %c0_28] : memref<8x8x128xf32, #tpu.memory_space<vmem>>, vector<1x8x128xf32>
    %21 = vector.shape_cast %20 : vector<1x8x128xf32> to vector<8x128xf32>
    %22 = arith.truncf %10 : vector<8x32xf32> to vector<8x32xbf16>
    %cst_29 = arith.constant dense<0.000000e+00> : vector<8x128xf32>
    %23 = tpu.matmul %22, %1, %cst_29 {dimension_numbers = #tpu.dot_dimension_numbers<[1], [0], [0], [1], [0, 0, 1, 1], [], []>} : vector<8x32xbf16>, vector<32x128xbf16>, vector<8x128xf32> -> vector<8x128xf32>
    %24 = arith.addf %21, %23 : vector<8x128xf32>
    %25 = math.tanh %24 : vector<8x128xf32>
    %26 = vector.extract_strided_slice %25 {offsets = [0, 0], sizes = [8, 32], strides = [1, 1]} : vector<8x128xf32> to vector<8x32xf32>
    %cst_30 = arith.constant 5.000000e-01 : f32
    %27 = vector.broadcast %cst_30 : f32 to vector<8x32xf32>
    %28 = arith.mulf %27, %26 : vector<8x32xf32>
    %cst_31 = arith.constant 5.000000e-01 : f32
    %29 = vector.broadcast %cst_31 : f32 to vector<8x32xf32>
    %30 = arith.addf %28, %29 : vector<8x32xf32>
    %31 = vector.extract_strided_slice %25 {offsets = [0, 32], sizes = [8, 32], strides = [1, 1]} : vector<8x128xf32> to vector<8x32xf32>
    %cst_32 = arith.constant 5.000000e-01 : f32
    %32 = vector.broadcast %cst_32 : f32 to vector<8x32xf32>
    %33 = arith.mulf %32, %31 : vector<8x32xf32>
    %cst_33 = arith.constant 5.000000e-01 : f32
    %34 = vector.broadcast %cst_33 : f32 to vector<8x32xf32>
    %35 = arith.addf %33, %34 : vector<8x32xf32>
    %36 = vector.extract_strided_slice %25 {offsets = [0, 64], sizes = [8, 32], strides = [1, 1]} : vector<8x128xf32> to vector<8x32xf32>
    %37 = vector.extract_strided_slice %25 {offsets = [0, 96], sizes = [8, 32], strides = [1, 1]} : vector<8x128xf32> to vector<8x32xf32>
    %cst_34 = arith.constant 5.000000e-01 : f32
    %38 = vector.broadcast %cst_34 : f32 to vector<8x32xf32>
    %39 = arith.mulf %38, %37 : vector<8x32xf32>
    %cst_35 = arith.constant 5.000000e-01 : f32
    %40 = vector.broadcast %cst_35 : f32 to vector<8x32xf32>
    %41 = arith.addf %39, %40 : vector<8x32xf32>
    %42 = arith.mulf %35, %11 : vector<8x32xf32>
    %43 = arith.mulf %30, %36 : vector<8x32xf32>
    %44 = arith.addf %42, %43 : vector<8x32xf32>
    %45 = math.tanh %44 : vector<8x32xf32>
    %46 = arith.mulf %41, %45 : vector<8x32xf32>
    %47 = arith.truncf %46 : vector<8x32xf32> to vector<8x32xbf16>
    %48 = arith.index_cast %c0_i32 : i32 to index
    %c0_36 = arith.constant 0 : index
    %c0_37 = arith.constant 0 : index
    %49 = vector.load %arg14[%48, %c0_36, %c0_37] : memref<8x8x32xbf16, #tpu.memory_space<vmem>>, vector<1x8x32xbf16>
    %50 = vector.shape_cast %49 : vector<1x8x32xbf16> to vector<8x32xbf16>
    %51 = vector.shape_cast %47 : vector<8x32xbf16> to vector<1x8x32xbf16>
    tpu.vector_store %arg14[%48, %c0_36, %c0_37], %51 {strides = array<i32>} : memref<8x8x32xbf16, #tpu.memory_space<vmem>>, vector<1x8x32xbf16>,
    %c1_i32 = arith.constant 1 : i32
    %52 = arith.index_cast %c1_i32 : i32 to index
    %c0_38 = arith.constant 0 : index
    %c0_39 = arith.constant 0 : index
    %53 = vector.load %arg13[%52, %c0_38, %c0_39] : memref<8x8x128xf32, #tpu.memory_space<vmem>>, vector<1x8x128xf32>
    %54 = vector.shape_cast %53 : vector<1x8x128xf32> to vector<8x128xf32>
    %55 = arith.truncf %46 : vector<8x32xf32> to vector<8x32xbf16>
    %cst_40 = arith.constant dense<0.000000e+00> : vector<8x128xf32>
    %56 = tpu.matmul %55, %1, %cst_40 {dimension_numbers = #tpu.dot_dimension_numbers<[1], [0], [0], [1], [0, 0, 1, 1], [], []>} : vector<8x32xbf16>, vector<32x128xbf16>, vector<8x128xf32> -> vector<8x128xf32>
    %57 = arith.addf %54, %56 : vector<8x128xf32>
    %58 = math.tanh %57 : vector<8x128xf32>
    %59 = vector.extract_strided_slice %58 {offsets = [0, 0], sizes = [8, 32], strides = [1, 1]} : vector<8x128xf32> to vector<8x32xf32>
    %cst_41 = arith.constant 5.000000e-01 : f32
    %60 = vector.broadcast %cst_41 : f32 to vector<8x32xf32>
    %61 = arith.mulf %60, %59 : vector<8x32xf32>
    %cst_42 = arith.constant 5.000000e-01 : f32
    %62 = vector.broadcast %cst_42 : f32 to vector<8x32xf32>
    %63 = arith.addf %61, %62 : vector<8x32xf32>
    %64 = vector.extract_strided_slice %58 {offsets = [0, 32], sizes = [8, 32], strides = [1, 1]} : vector<8x128xf32> to vector<8x32xf32>
    %cst_43 = arith.constant 5.000000e-01 : f32
    %65 = vector.broadcast %cst_43 : f32 to vector<8x32xf32>
    %66 = arith.mulf %65, %64 : vector<8x32xf32>
    %cst_44 = arith.constant 5.000000e-01 : f32
    %67 = vector.broadcast %cst_44 : f32 to vector<8x32xf32>
    %68 = arith.addf %66, %67 : vector<8x32xf32>
    %69 = vector.extract_strided_slice %58 {offsets = [0, 64], sizes = [8, 32], strides = [1, 1]} : vector<8x128xf32> to vector<8x32xf32>
    %70 = vector.extract_strided_slice %58 {offsets = [0, 96], sizes = [8, 32], strides = [1, 1]} : vector<8x128xf32> to vector<8x32xf32>
    %cst_45 = arith.constant 5.000000e-01 : f32
    %71 = vector.broadcast %cst_45 : f32 to vector<8x32xf32>
    %72 = arith.mulf %71, %70 : vector<8x32xf32>
    %cst_46 = arith.constant 5.000000e-01 : f32
    %73 = vector.broadcast %cst_46 : f32 to vector<8x32xf32>
    %74 = arith.addf %72, %73 : vector<8x32xf32>
    %75 = arith.mulf %68, %44 : vector<8x32xf32>
    %76 = arith.mulf %63, %69 : vector<8x32xf32>
    %77 = arith.addf %75, %76 : vector<8x32xf32>
    %78 = math.tanh %77 : vector<8x32xf32>
    %79 = arith.mulf %74, %78 : vector<8x32xf32>
    %80 = arith.truncf %79 : vector<8x32xf32> to vector<8x32xbf16>
    %81 = arith.index_cast %c1_i32 : i32 to index
    %c0_47 = arith.constant 0 : index
    %c0_48 = arith.constant 0 : index
    %82 = vector.load %arg14[%81, %c0_47, %c0_48] : memref<8x8x32xbf16, #tpu.memory_space<vmem>>, vector<1x8x32xbf16>
    %83 = vector.shape_cast %82 : vector<1x8x32xbf16> to vector<8x32xbf16>
    %84 = vector.shape_cast %80 : vector<8x32xbf16> to vector<1x8x32xbf16>
    tpu.vector_store %arg14[%81, %c0_47, %c0_48], %84 {strides = array<i32>} : memref<8x8x32xbf16, #tpu.memory_space<vmem>>, vector<1x8x32xbf16>,
    %c2_i32 = arith.constant 2 : i32
    %85 = arith.index_cast %c2_i32 : i32 to index
    %c0_49 = arith.constant 0 : index
    %c0_50 = arith.constant 0 : index
    %86 = vector.load %arg13[%85, %c0_49, %c0_50] : memref<8x8x128xf32, #tpu.memory_space<vmem>>, vector<1x8x128xf32>
    %87 = vector.shape_cast %86 : vector<1x8x128xf32> to vector<8x128xf32>
    %88 = arith.truncf %79 : vector<8x32xf32> to vector<8x32xbf16>
    %cst_51 = arith.constant dense<0.000000e+00> : vector<8x128xf32>
    %89 = tpu.matmul %88, %1, %cst_51 {dimension_numbers = #tpu.dot_dimension_numbers<[1], [0], [0], [1], [0, 0, 1, 1], [], []>} : vector<8x32xbf16>, vector<32x128xbf16>, vector<8x128xf32> -> vector<8x128xf32>
    %90 = arith.addf %87, %89 : vector<8x128xf32>
    %91 = math.tanh %90 : vector<8x128xf32>
    %92 = vector.extract_strided_slice %91 {offsets = [0, 0], sizes = [8, 32], strides = [1, 1]} : vector<8x128xf32> to vector<8x32xf32>
    %cst_52 = arith.constant 5.000000e-01 : f32
    %93 = vector.broadcast %cst_52 : f32 to vector<8x32xf32>
    %94 = arith.mulf %93, %92 : vector<8x32xf32>
    %cst_53 = arith.constant 5.000000e-01 : f32
    %95 = vector.broadcast %cst_53 : f32 to vector<8x32xf32>
    %96 = arith.addf %94, %95 : vector<8x32xf32>
    %97 = vector.extract_strided_slice %91 {offsets = [0, 32], sizes = [8, 32], strides = [1, 1]} : vector<8x128xf32> to vector<8x32xf32>
    %cst_54 = arith.constant 5.000000e-01 : f32
    %98 = vector.broadcast %cst_54 : f32 to vector<8x32xf32>
    %99 = arith.mulf %98, %97 : vector<8x32xf32>
    %cst_55 = arith.constant 5.000000e-01 : f32
    %100 = vector.broadcast %cst_55 : f32 to vector<8x32xf32>
    %101 = arith.addf %99, %100 : vector<8x32xf32>
    %102 = vector.extract_strided_slice %91 {offsets = [0, 64], sizes = [8, 32], strides = [1, 1]} : vector<8x128xf32> to vector<8x32xf32>
    %103 = vector.extract_strided_slice %91 {offsets = [0, 96], sizes = [8, 32], strides = [1, 1]} : vector<8x128xf32> to vector<8x32xf32>
    %cst_56 = arith.constant 5.000000e-01 : f32
    %104 = vector.broadcast %cst_56 : f32 to vector<8x32xf32>
    %105 = arith.mulf %104, %103 : vector<8x32xf32>
    %cst_57 = arith.constant 5.000000e-01 : f32
    %106 = vector.broadcast %cst_57 : f32 to vector<8x32xf32>
    %107 = arith.addf %105, %106 : vector<8x32xf32>
    %108 = arith.mulf %101, %77 : vector<8x32xf32>
    %109 = arith.mulf %96, %102 : vector<8x32xf32>
    %110 = arith.addf %108, %109 : vector<8x32xf32>
    %111 = math.tanh %110 : vector<8x32xf32>
    %112 = arith.mulf %107, %111 : vector<8x32xf32>
    %113 = arith.truncf %112 : vector<8x32xf32> to vector<8x32xbf16>
    %114 = arith.index_cast %c2_i32 : i32 to index
    %c0_58 = arith.constant 0 : index
    %c0_59 = arith.constant 0 : index
    %115 = vector.load %arg14[%114, %c0_58, %c0_59] : memref<8x8x32xbf16, #tpu.memory_space<vmem>>, vector<1x8x32xbf16>
    %116 = vector.shape_cast %115 : vector<1x8x32xbf16> to vector<8x32xbf16>
    %117 = vector.shape_cast %113 : vector<8x32xbf16> to vector<1x8x32xbf16>
    tpu.vector_store %arg14[%114, %c0_58, %c0_59], %117 {strides = array<i32>} : memref<8x8x32xbf16, #tpu.memory_space<vmem>>, vector<1x8x32xbf16>,
    %c3_i32 = arith.constant 3 : i32
    %118 = arith.index_cast %c3_i32 : i32 to index
    %c0_60 = arith.constant 0 : index
    %c0_61 = arith.constant 0 : index
    %119 = vector.load %arg13[%118, %c0_60, %c0_61] : memref<8x8x128xf32, #tpu.memory_space<vmem>>, vector<1x8x128xf32>
    %120 = vector.shape_cast %119 : vector<1x8x128xf32> to vector<8x128xf32>
    %121 = arith.truncf %112 : vector<8x32xf32> to vector<8x32xbf16>
    %cst_62 = arith.constant dense<0.000000e+00> : vector<8x128xf32>
    %122 = tpu.matmul %121, %1, %cst_62 {dimension_numbers = #tpu.dot_dimension_numbers<[1], [0], [0], [1], [0, 0, 1, 1], [], []>} : vector<8x32xbf16>, vector<32x128xbf16>, vector<8x128xf32> -> vector<8x128xf32>
    %123 = arith.addf %120, %122 : vector<8x128xf32>
    %124 = math.tanh %123 : vector<8x128xf32>
    %125 = vector.extract_strided_slice %124 {offsets = [0, 0], sizes = [8, 32], strides = [1, 1]} : vector<8x128xf32> to vector<8x32xf32>
    %cst_63 = arith.constant 5.000000e-01 : f32
    %126 = vector.broadcast %cst_63 : f32 to vector<8x32xf32>
    %127 = arith.mulf %126, %125 : vector<8x32xf32>
    %cst_64 = arith.constant 5.000000e-01 : f32
    %128 = vector.broadcast %cst_64 : f32 to vector<8x32xf32>
    %129 = arith.addf %127, %128 : vector<8x32xf32>
    %130 = vector.extract_strided_slice %124 {offsets = [0, 32], sizes = [8, 32], strides = [1, 1]} : vector<8x128xf32> to vector<8x32xf32>
    %cst_65 = arith.constant 5.000000e-01 : f32
    %131 = vector.broadcast %cst_65 : f32 to vector<8x32xf32>
    %132 = arith.mulf %131, %130 : vector<8x32xf32>
    %cst_66 = arith.constant 5.000000e-01 : f32
    %133 = vector.broadcast %cst_66 : f32 to vector<8x32xf32>
    %134 = arith.addf %132, %133 : vector<8x32xf32>
    %135 = vector.extract_strided_slice %124 {offsets = [0, 64], sizes = [8, 32], strides = [1, 1]} : vector<8x128xf32> to vector<8x32xf32>
    %136 = vector.extract_strided_slice %124 {offsets = [0, 96], sizes = [8, 32], strides = [1, 1]} : vector<8x128xf32> to vector<8x32xf32>
    %cst_67 = arith.constant 5.000000e-01 : f32
    %137 = vector.broadcast %cst_67 : f32 to vector<8x32xf32>
    %138 = arith.mulf %137, %136 : vector<8x32xf32>
    %cst_68 = arith.constant 5.000000e-01 : f32
    %139 = vector.broadcast %cst_68 : f32 to vector<8x32xf32>
    %140 = arith.addf %138, %139 : vector<8x32xf32>
    %141 = arith.mulf %134, %110 : vector<8x32xf32>
    %142 = arith.mulf %129, %135 : vector<8x32xf32>
    %143 = arith.addf %141, %142 : vector<8x32xf32>
    %144 = math.tanh %143 : vector<8x32xf32>
    %145 = arith.mulf %140, %144 : vector<8x32xf32>
    %146 = arith.truncf %145 : vector<8x32xf32> to vector<8x32xbf16>
    %147 = arith.index_cast %c3_i32 : i32 to index
    %c0_69 = arith.constant 0 : index
    %c0_70 = arith.constant 0 : index
    %148 = vector.load %arg14[%147, %c0_69, %c0_70] : memref<8x8x32xbf16, #tpu.memory_space<vmem>>, vector<1x8x32xbf16>
    %149 = vector.shape_cast %148 : vector<1x8x32xbf16> to vector<8x32xbf16>
    %150 = vector.shape_cast %146 : vector<8x32xbf16> to vector<1x8x32xbf16>
    tpu.vector_store %arg14[%147, %c0_69, %c0_70], %150 {strides = array<i32>} : memref<8x8x32xbf16, #tpu.memory_space<vmem>>, vector<1x8x32xbf16>,
    %c4_i32 = arith.constant 4 : i32
    %151 = arith.index_cast %c4_i32 : i32 to index
    %c0_71 = arith.constant 0 : index
    %c0_72 = arith.constant 0 : index
    %152 = vector.load %arg13[%151, %c0_71, %c0_72] : memref<8x8x128xf32, #tpu.memory_space<vmem>>, vector<1x8x128xf32>
    %153 = vector.shape_cast %152 : vector<1x8x128xf32> to vector<8x128xf32>
    %154 = arith.truncf %145 : vector<8x32xf32> to vector<8x32xbf16>
    %cst_73 = arith.constant dense<0.000000e+00> : vector<8x128xf32>
    %155 = tpu.matmul %154, %1, %cst_73 {dimension_numbers = #tpu.dot_dimension_numbers<[1], [0], [0], [1], [0, 0, 1, 1], [], []>} : vector<8x32xbf16>, vector<32x128xbf16>, vector<8x128xf32> -> vector<8x128xf32>
    %156 = arith.addf %153, %155 : vector<8x128xf32>
    %157 = math.tanh %156 : vector<8x128xf32>
    %158 = vector.extract_strided_slice %157 {offsets = [0, 0], sizes = [8, 32], strides = [1, 1]} : vector<8x128xf32> to vector<8x32xf32>
    %cst_74 = arith.constant 5.000000e-01 : f32
    %159 = vector.broadcast %cst_74 : f32 to vector<8x32xf32>
    %160 = arith.mulf %159, %158 : vector<8x32xf32>
    %cst_75 = arith.constant 5.000000e-01 : f32
    %161 = vector.broadcast %cst_75 : f32 to vector<8x32xf32>
    %162 = arith.addf %160, %161 : vector<8x32xf32>
    %163 = vector.extract_strided_slice %157 {offsets = [0, 32], sizes = [8, 32], strides = [1, 1]} : vector<8x128xf32> to vector<8x32xf32>
    %cst_76 = arith.constant 5.000000e-01 : f32
    %164 = vector.broadcast %cst_76 : f32 to vector<8x32xf32>
    %165 = arith.mulf %164, %163 : vector<8x32xf32>
    %cst_77 = arith.constant 5.000000e-01 : f32
    %166 = vector.broadcast %cst_77 : f32 to vector<8x32xf32>
    %167 = arith.addf %165, %166 : vector<8x32xf32>
    %168 = vector.extract_strided_slice %157 {offsets = [0, 64], sizes = [8, 32], strides = [1, 1]} : vector<8x128xf32> to vector<8x32xf32>
    %169 = vector.extract_strided_slice %157 {offsets = [0, 96], sizes = [8, 32], strides = [1, 1]} : vector<8x128xf32> to vector<8x32xf32>
    %cst_78 = arith.constant 5.000000e-01 : f32
    %170 = vector.broadcast %cst_78 : f32 to vector<8x32xf32>
    %171 = arith.mulf %170, %169 : vector<8x32xf32>
    %cst_79 = arith.constant 5.000000e-01 : f32
    %172 = vector.broadcast %cst_79 : f32 to vector<8x32xf32>
    %173 = arith.addf %171, %172 : vector<8x32xf32>
    %174 = arith.mulf %167, %143 : vector<8x32xf32>
    %175 = arith.mulf %162, %168 : vector<8x32xf32>
    %176 = arith.addf %174, %175 : vector<8x32xf32>
    %177 = math.tanh %176 : vector<8x32xf32>
    %178 = arith.mulf %173, %177 : vector<8x32xf32>
    %179 = arith.truncf %178 : vector<8x32xf32> to vector<8x32xbf16>
    %180 = arith.index_cast %c4_i32 : i32 to index
    %c0_80 = arith.constant 0 : index
    %c0_81 = arith.constant 0 : index
    %181 = vector.load %arg14[%180, %c0_80, %c0_81] : memref<8x8x32xbf16, #tpu.memory_space<vmem>>, vector<1x8x32xbf16>
    %182 = vector.shape_cast %181 : vector<1x8x32xbf16> to vector<8x32xbf16>
    %183 = vector.shape_cast %179 : vector<8x32xbf16> to vector<1x8x32xbf16>
    tpu.vector_store %arg14[%180, %c0_80, %c0_81], %183 {strides = array<i32>} : memref<8x8x32xbf16, #tpu.memory_space<vmem>>, vector<1x8x32xbf16>,
    %c5_i32 = arith.constant 5 : i32
    %184 = arith.index_cast %c5_i32 : i32 to index
    %c0_82 = arith.constant 0 : index
    %c0_83 = arith.constant 0 : index
    %185 = vector.load %arg13[%184, %c0_82, %c0_83] : memref<8x8x128xf32, #tpu.memory_space<vmem>>, vector<1x8x128xf32>
    %186 = vector.shape_cast %185 : vector<1x8x128xf32> to vector<8x128xf32>
    %187 = arith.truncf %178 : vector<8x32xf32> to vector<8x32xbf16>
    %cst_84 = arith.constant dense<0.000000e+00> : vector<8x128xf32>
    %188 = tpu.matmul %187, %1, %cst_84 {dimension_numbers = #tpu.dot_dimension_numbers<[1], [0], [0], [1], [0, 0, 1, 1], [], []>} : vector<8x32xbf16>, vector<32x128xbf16>, vector<8x128xf32> -> vector<8x128xf32>
    %189 = arith.addf %186, %188 : vector<8x128xf32>
    %190 = math.tanh %189 : vector<8x128xf32>
    %191 = vector.extract_strided_slice %190 {offsets = [0, 0], sizes = [8, 32], strides = [1, 1]} : vector<8x128xf32> to vector<8x32xf32>
    %cst_85 = arith.constant 5.000000e-01 : f32
    %192 = vector.broadcast %cst_85 : f32 to vector<8x32xf32>
    %193 = arith.mulf %192, %191 : vector<8x32xf32>
    %cst_86 = arith.constant 5.000000e-01 : f32
    %194 = vector.broadcast %cst_86 : f32 to vector<8x32xf32>
    %195 = arith.addf %193, %194 : vector<8x32xf32>
    %196 = vector.extract_strided_slice %190 {offsets = [0, 32], sizes = [8, 32], strides = [1, 1]} : vector<8x128xf32> to vector<8x32xf32>
    %cst_87 = arith.constant 5.000000e-01 : f32
    %197 = vector.broadcast %cst_87 : f32 to vector<8x32xf32>
    %198 = arith.mulf %197, %196 : vector<8x32xf32>
    %cst_88 = arith.constant 5.000000e-01 : f32
    %199 = vector.broadcast %cst_88 : f32 to vector<8x32xf32>
    %200 = arith.addf %198, %199 : vector<8x32xf32>
    %201 = vector.extract_strided_slice %190 {offsets = [0, 64], sizes = [8, 32], strides = [1, 1]} : vector<8x128xf32> to vector<8x32xf32>
    %202 = vector.extract_strided_slice %190 {offsets = [0, 96], sizes = [8, 32], strides = [1, 1]} : vector<8x128xf32> to vector<8x32xf32>
    %cst_89 = arith.constant 5.000000e-01 : f32
    %203 = vector.broadcast %cst_89 : f32 to vector<8x32xf32>
    %204 = arith.mulf %203, %202 : vector<8x32xf32>
    %cst_90 = arith.constant 5.000000e-01 : f32
    %205 = vector.broadcast %cst_90 : f32 to vector<8x32xf32>
    %206 = arith.addf %204, %205 : vector<8x32xf32>
    %207 = arith.mulf %200, %176 : vector<8x32xf32>
    %208 = arith.mulf %195, %201 : vector<8x32xf32>
    %209 = arith.addf %207, %208 : vector<8x32xf32>
    %210 = math.tanh %209 : vector<8x32xf32>
    %211 = arith.mulf %206, %210 : vector<8x32xf32>
    %212 = arith.truncf %211 : vector<8x32xf32> to vector<8x32xbf16>
    %213 = arith.index_cast %c5_i32 : i32 to index
    %c0_91 = arith.constant 0 : index
    %c0_92 = arith.constant 0 : index
    %214 = vector.load %arg14[%213, %c0_91, %c0_92] : memref<8x8x32xbf16, #tpu.memory_space<vmem>>, vector<1x8x32xbf16>
    %215 = vector.shape_cast %214 : vector<1x8x32xbf16> to vector<8x32xbf16>
    %216 = vector.shape_cast %212 : vector<8x32xbf16> to vector<1x8x32xbf16>
    tpu.vector_store %arg14[%213, %c0_91, %c0_92], %216 {strides = array<i32>} : memref<8x8x32xbf16, #tpu.memory_space<vmem>>, vector<1x8x32xbf16>,
    %c6_i32 = arith.constant 6 : i32
    %217 = arith.index_cast %c6_i32 : i32 to index
    %c0_93 = arith.constant 0 : index
    %c0_94 = arith.constant 0 : index
    %218 = vector.load %arg13[%217, %c0_93, %c0_94] : memref<8x8x128xf32, #tpu.memory_space<vmem>>, vector<1x8x128xf32>
    %219 = vector.shape_cast %218 : vector<1x8x128xf32> to vector<8x128xf32>
    %220 = arith.truncf %211 : vector<8x32xf32> to vector<8x32xbf16>
    %cst_95 = arith.constant dense<0.000000e+00> : vector<8x128xf32>
    %221 = tpu.matmul %220, %1, %cst_95 {dimension_numbers = #tpu.dot_dimension_numbers<[1], [0], [0], [1], [0, 0, 1, 1], [], []>} : vector<8x32xbf16>, vector<32x128xbf16>, vector<8x128xf32> -> vector<8x128xf32>
    %222 = arith.addf %219, %221 : vector<8x128xf32>
    %223 = math.tanh %222 : vector<8x128xf32>
    %224 = vector.extract_strided_slice %223 {offsets = [0, 0], sizes = [8, 32], strides = [1, 1]} : vector<8x128xf32> to vector<8x32xf32>
    %cst_96 = arith.constant 5.000000e-01 : f32
    %225 = vector.broadcast %cst_96 : f32 to vector<8x32xf32>
    %226 = arith.mulf %225, %224 : vector<8x32xf32>
    %cst_97 = arith.constant 5.000000e-01 : f32
    %227 = vector.broadcast %cst_97 : f32 to vector<8x32xf32>
    %228 = arith.addf %226, %227 : vector<8x32xf32>
    %229 = vector.extract_strided_slice %223 {offsets = [0, 32], sizes = [8, 32], strides = [1, 1]} : vector<8x128xf32> to vector<8x32xf32>
    %cst_98 = arith.constant 5.000000e-01 : f32
    %230 = vector.broadcast %cst_98 : f32 to vector<8x32xf32>
    %231 = arith.mulf %230, %229 : vector<8x32xf32>
    %cst_99 = arith.constant 5.000000e-01 : f32
    %232 = vector.broadcast %cst_99 : f32 to vector<8x32xf32>
    %233 = arith.addf %231, %232 : vector<8x32xf32>
    %234 = vector.extract_strided_slice %223 {offsets = [0, 64], sizes = [8, 32], strides = [1, 1]} : vector<8x128xf32> to vector<8x32xf32>
    %235 = vector.extract_strided_slice %223 {offsets = [0, 96], sizes = [8, 32], strides = [1, 1]} : vector<8x128xf32> to vector<8x32xf32>
    %cst_100 = arith.constant 5.000000e-01 : f32
    %236 = vector.broadcast %cst_100 : f32 to vector<8x32xf32>
    %237 = arith.mulf %236, %235 : vector<8x32xf32>
    %cst_101 = arith.constant 5.000000e-01 : f32
    %238 = vector.broadcast %cst_101 : f32 to vector<8x32xf32>
    %239 = arith.addf %237, %238 : vector<8x32xf32>
    %240 = arith.mulf %233, %209 : vector<8x32xf32>
    %241 = arith.mulf %228, %234 : vector<8x32xf32>
    %242 = arith.addf %240, %241 : vector<8x32xf32>
    %243 = math.tanh %242 : vector<8x32xf32>
    %244 = arith.mulf %239, %243 : vector<8x32xf32>
    %245 = arith.truncf %244 : vector<8x32xf32> to vector<8x32xbf16>
    %246 = arith.index_cast %c6_i32 : i32 to index
    %c0_102 = arith.constant 0 : index
    %c0_103 = arith.constant 0 : index
    %247 = vector.load %arg14[%246, %c0_102, %c0_103] : memref<8x8x32xbf16, #tpu.memory_space<vmem>>, vector<1x8x32xbf16>
    %248 = vector.shape_cast %247 : vector<1x8x32xbf16> to vector<8x32xbf16>
    %249 = vector.shape_cast %245 : vector<8x32xbf16> to vector<1x8x32xbf16>
    tpu.vector_store %arg14[%246, %c0_102, %c0_103], %249 {strides = array<i32>} : memref<8x8x32xbf16, #tpu.memory_space<vmem>>, vector<1x8x32xbf16>,
    %c7_i32 = arith.constant 7 : i32
    %250 = arith.index_cast %c7_i32 : i32 to index
    %c0_104 = arith.constant 0 : index
    %c0_105 = arith.constant 0 : index
    %251 = vector.load %arg13[%250, %c0_104, %c0_105] : memref<8x8x128xf32, #tpu.memory_space<vmem>>, vector<1x8x128xf32>
    %252 = vector.shape_cast %251 : vector<1x8x128xf32> to vector<8x128xf32>
    %253 = arith.truncf %244 : vector<8x32xf32> to vector<8x32xbf16>
    %cst_106 = arith.constant dense<0.000000e+00> : vector<8x128xf32>
    %254 = tpu.matmul %253, %1, %cst_106 {dimension_numbers = #tpu.dot_dimension_numbers<[1], [0], [0], [1], [0, 0, 1, 1], [], []>} : vector<8x32xbf16>, vector<32x128xbf16>, vector<8x128xf32> -> vector<8x128xf32>
    %255 = arith.addf %252, %254 : vector<8x128xf32>
    %256 = math.tanh %255 : vector<8x128xf32>
    %257 = vector.extract_strided_slice %256 {offsets = [0, 0], sizes = [8, 32], strides = [1, 1]} : vector<8x128xf32> to vector<8x32xf32>
    %cst_107 = arith.constant 5.000000e-01 : f32
    %258 = vector.broadcast %cst_107 : f32 to vector<8x32xf32>
    %259 = arith.mulf %258, %257 : vector<8x32xf32>
    %cst_108 = arith.constant 5.000000e-01 : f32
    %260 = vector.broadcast %cst_108 : f32 to vector<8x32xf32>
    %261 = arith.addf %259, %260 : vector<8x32xf32>
    %262 = vector.extract_strided_slice %256 {offsets = [0, 32], sizes = [8, 32], strides = [1, 1]} : vector<8x128xf32> to vector<8x32xf32>
    %cst_109 = arith.constant 5.000000e-01 : f32
    %263 = vector.broadcast %cst_109 : f32 to vector<8x32xf32>
    %264 = arith.mulf %263, %262 : vector<8x32xf32>
    %cst_110 = arith.constant 5.000000e-01 : f32
    %265 = vector.broadcast %cst_110 : f32 to vector<8x32xf32>
    %266 = arith.addf %264, %265 : vector<8x32xf32>
    %267 = vector.extract_strided_slice %256 {offsets = [0, 64], sizes = [8, 32], strides = [1, 1]} : vector<8x128xf32> to vector<8x32xf32>
    %268 = vector.extract_strided_slice %256 {offsets = [0, 96], sizes = [8, 32], strides = [1, 1]} : vector<8x128xf32> to vector<8x32xf32>
    %cst_111 = arith.constant 5.000000e-01 : f32
    %269 = vector.broadcast %cst_111 : f32 to vector<8x32xf32>
    %270 = arith.mulf %269, %268 : vector<8x32xf32>
    %cst_112 = arith.constant 5.000000e-01 : f32
    %271 = vector.broadcast %cst_112 : f32 to vector<8x32xf32>
    %272 = arith.addf %270, %271 : vector<8x32xf32>
    %273 = arith.mulf %266, %242 : vector<8x32xf32>
    %274 = arith.mulf %261, %267 : vector<8x32xf32>
    %275 = arith.addf %273, %274 : vector<8x32xf32>
    %276 = math.tanh %275 : vector<8x32xf32>
    %277 = arith.mulf %272, %276 : vector<8x32xf32>
    %278 = arith.truncf %277 : vector<8x32xf32> to vector<8x32xbf16>
    %279 = arith.index_cast %c7_i32 : i32 to index
    %c0_113 = arith.constant 0 : index
    %c0_114 = arith.constant 0 : index
    %280 = vector.load %arg14[%279, %c0_113, %c0_114] : memref<8x8x32xbf16, #tpu.memory_space<vmem>>, vector<1x8x32xbf16>
    %281 = vector.shape_cast %280 : vector<1x8x32xbf16> to vector<8x32xbf16>
    %282 = vector.shape_cast %278 : vector<8x32xbf16> to vector<1x8x32xbf16>
    tpu.vector_store %arg14[%279, %c0_113, %c0_114], %282 {strides = array<i32>} : memref<8x8x32xbf16, #tpu.memory_space<vmem>>, vector<1x8x32xbf16>,
    %c8_i32 = arith.constant 8 : i32
    %c0_115 = arith.constant 0 : index
    %c0_116 = arith.constant 0 : index
    %c0_117 = arith.constant 0 : index
    %283 = vector.load %arg14[%c0_115, %c0_116, %c0_117] : memref<8x8x32xbf16, #tpu.memory_space<vmem>>, vector<8x8x32xbf16>
    %284 = vector.shape_cast %283 : vector<8x8x32xbf16> to vector<64x32xbf16>
    %cst_118 = arith.constant dense<0.000000e+00> : vector<64x128xf32>
    %285 = tpu.matmul %284, %3, %cst_118 {dimension_numbers = #tpu.dot_dimension_numbers<[1], [0], [0], [1], [0, 0, 1, 1], [], []>} : vector<64x32xbf16>, vector<32x128xbf16>, vector<64x128xf32> -> vector<64x128xf32>
    %286 = vector.broadcast %5 : vector<1x128xf32> to vector<64x128xf32>
    %287 = arith.addf %285, %286 : vector<64x128xf32>
    %288 = vector.shape_cast %287 : vector<64x128xf32> to vector<8x8x128xf32>
    %c0_119 = arith.constant 0 : index
    %c0_120 = arith.constant 0 : index
    %c0_121 = arith.constant 0 : index
    %289 = vector.load %arg13[%c0_119, %c0_120, %c0_121] : memref<8x8x128xf32, #tpu.memory_space<vmem>>, vector<8x8x128xf32>
    tpu.vector_store %arg13[%c0_119, %c0_120, %c0_121], %288 {strides = array<i32>} : memref<8x8x128xf32, #tpu.memory_space<vmem>>, vector<8x8x128xf32>,
    %c0_i32_122 = arith.constant 0 : i32
    %290 = arith.index_cast %c0_i32_122 : i32 to index
    %c0_123 = arith.constant 0 : index
    %c0_124 = arith.constant 0 : index
    %291 = vector.load %arg13[%290, %c0_123, %c0_124] : memref<8x8x128xf32, #tpu.memory_space<vmem>>, vector<1x8x128xf32>
    %292 = vector.shape_cast %291 : vector<1x8x128xf32> to vector<8x128xf32>
    %293 = arith.truncf %10 : vector<8x32xf32> to vector<8x32xbf16>
    %cst_125 = arith.constant dense<0.000000e+00> : vector<8x128xf32>
    %294 = tpu.matmul %293, %4, %cst_125 {dimension_numbers = #tpu.dot_dimension_numbers<[1], [0], [0], [1], [0, 0, 1, 1], [], []>} : vector<8x32xbf16>, vector<32x128xbf16>, vector<8x128xf32> -> vector<8x128xf32>
    %295 = arith.addf %292, %294 : vector<8x128xf32>
    %296 = math.tanh %295 : vector<8x128xf32>
    %297 = vector.extract_strided_slice %296 {offsets = [0, 0], sizes = [8, 32], strides = [1, 1]} : vector<8x128xf32> to vector<8x32xf32>
    %cst_126 = arith.constant 5.000000e-01 : f32
    %298 = vector.broadcast %cst_126 : f32 to vector<8x32xf32>
    %299 = arith.mulf %298, %297 : vector<8x32xf32>
    %cst_127 = arith.constant 5.000000e-01 : f32
    %300 = vector.broadcast %cst_127 : f32 to vector<8x32xf32>
    %301 = arith.addf %299, %300 : vector<8x32xf32>
    %302 = vector.extract_strided_slice %296 {offsets = [0, 32], sizes = [8, 32], strides = [1, 1]} : vector<8x128xf32> to vector<8x32xf32>
    %cst_128 = arith.constant 5.000000e-01 : f32
    %303 = vector.broadcast %cst_128 : f32 to vector<8x32xf32>
    %304 = arith.mulf %303, %302 : vector<8x32xf32>
    %cst_129 = arith.constant 5.000000e-01 : f32
    %305 = vector.broadcast %cst_129 : f32 to vector<8x32xf32>
    %306 = arith.addf %304, %305 : vector<8x32xf32>
    %307 = vector.extract_strided_slice %296 {offsets = [0, 64], sizes = [8, 32], strides = [1, 1]} : vector<8x128xf32> to vector<8x32xf32>
    %308 = vector.extract_strided_slice %296 {offsets = [0, 96], sizes = [8, 32], strides = [1, 1]} : vector<8x128xf32> to vector<8x32xf32>
    %cst_130 = arith.constant 5.000000e-01 : f32
    %309 = vector.broadcast %cst_130 : f32 to vector<8x32xf32>
    %310 = arith.mulf %309, %308 : vector<8x32xf32>
    %cst_131 = arith.constant 5.000000e-01 : f32
    %311 = vector.broadcast %cst_131 : f32 to vector<8x32xf32>
    %312 = arith.addf %310, %311 : vector<8x32xf32>
    %313 = arith.mulf %306, %11 : vector<8x32xf32>
    %314 = arith.mulf %301, %307 : vector<8x32xf32>
    %315 = arith.addf %313, %314 : vector<8x32xf32>
    %316 = math.tanh %315 : vector<8x32xf32>
    %317 = arith.mulf %312, %316 : vector<8x32xf32>
    %c1_i32_132 = arith.constant 1 : i32
    %318 = arith.index_cast %c1_i32_132 : i32 to index
    %c0_133 = arith.constant 0 : index
    %c0_134 = arith.constant 0 : index
    %319 = vector.load %arg13[%318, %c0_133, %c0_134] : memref<8x8x128xf32, #tpu.memory_space<vmem>>, vector<1x8x128xf32>
    %320 = vector.shape_cast %319 : vector<1x8x128xf32> to vector<8x128xf32>
    %321 = arith.truncf %317 : vector<8x32xf32> to vector<8x32xbf16>
    %cst_135 = arith.constant dense<0.000000e+00> : vector<8x128xf32>
    %322 = tpu.matmul %321, %4, %cst_135 {dimension_numbers = #tpu.dot_dimension_numbers<[1], [0], [0], [1], [0, 0, 1, 1], [], []>} : vector<8x32xbf16>, vector<32x128xbf16>, vector<8x128xf32> -> vector<8x128xf32>
    %323 = arith.addf %320, %322 : vector<8x128xf32>
    %324 = math.tanh %323 : vector<8x128xf32>
    %325 = vector.extract_strided_slice %324 {offsets = [0, 0], sizes = [8, 32], strides = [1, 1]} : vector<8x128xf32> to vector<8x32xf32>
    %cst_136 = arith.constant 5.000000e-01 : f32
    %326 = vector.broadcast %cst_136 : f32 to vector<8x32xf32>
    %327 = arith.mulf %326, %325 : vector<8x32xf32>
    %cst_137 = arith.constant 5.000000e-01 : f32
    %328 = vector.broadcast %cst_137 : f32 to vector<8x32xf32>
    %329 = arith.addf %327, %328 : vector<8x32xf32>
    %330 = vector.extract_strided_slice %324 {offsets = [0, 32], sizes = [8, 32], strides = [1, 1]} : vector<8x128xf32> to vector<8x32xf32>
    %cst_138 = arith.constant 5.000000e-01 : f32
    %331 = vector.broadcast %cst_138 : f32 to vector<8x32xf32>
    %332 = arith.mulf %331, %330 : vector<8x32xf32>
    %cst_139 = arith.constant 5.000000e-01 : f32
    %333 = vector.broadcast %cst_139 : f32 to vector<8x32xf32>
    %334 = arith.addf %332, %333 : vector<8x32xf32>
    %335 = vector.extract_strided_slice %324 {offsets = [0, 64], sizes = [8, 32], strides = [1, 1]} : vector<8x128xf32> to vector<8x32xf32>
    %336 = vector.extract_strided_slice %324 {offsets = [0, 96], sizes = [8, 32], strides = [1, 1]} : vector<8x128xf32> to vector<8x32xf32>
    %cst_140 = arith.constant 5.000000e-01 : f32
    %337 = vector.broadcast %cst_140 : f32 to vector<8x32xf32>
    %338 = arith.mulf %337, %336 : vector<8x32xf32>
    %cst_141 = arith.constant 5.000000e-01 : f32
    %339 = vector.broadcast %cst_141 : f32 to vector<8x32xf32>
    %340 = arith.addf %338, %339 : vector<8x32xf32>
    %341 = arith.mulf %334, %315 : vector<8x32xf32>
    %342 = arith.mulf %329, %335 : vector<8x32xf32>
    %343 = arith.addf %341, %342 : vector<8x32xf32>
    %344 = math.tanh %343 : vector<8x32xf32>
    %345 = arith.mulf %340, %344 : vector<8x32xf32>
    %c2_i32_142 = arith.constant 2 : i32
    %346 = arith.index_cast %c2_i32_142 : i32 to index
    %c0_143 = arith.constant 0 : index
    %c0_144 = arith.constant 0 : index
    %347 = vector.load %arg13[%346, %c0_143, %c0_144] : memref<8x8x128xf32, #tpu.memory_space<vmem>>, vector<1x8x128xf32>
    %348 = vector.shape_cast %347 : vector<1x8x128xf32> to vector<8x128xf32>
    %349 = arith.truncf %345 : vector<8x32xf32> to vector<8x32xbf16>
    %cst_145 = arith.constant dense<0.000000e+00> : vector<8x128xf32>
    %350 = tpu.matmul %349, %4, %cst_145 {dimension_numbers = #tpu.dot_dimension_numbers<[1], [0], [0], [1], [0, 0, 1, 1], [], []>} : vector<8x32xbf16>, vector<32x128xbf16>, vector<8x128xf32> -> vector<8x128xf32>
    %351 = arith.addf %348, %350 : vector<8x128xf32>
    %352 = math.tanh %351 : vector<8x128xf32>
    %353 = vector.extract_strided_slice %352 {offsets = [0, 0], sizes = [8, 32], strides = [1, 1]} : vector<8x128xf32> to vector<8x32xf32>
    %cst_146 = arith.constant 5.000000e-01 : f32
    %354 = vector.broadcast %cst_146 : f32 to vector<8x32xf32>
    %355 = arith.mulf %354, %353 : vector<8x32xf32>
    %cst_147 = arith.constant 5.000000e-01 : f32
    %356 = vector.broadcast %cst_147 : f32 to vector<8x32xf32>
    %357 = arith.addf %355, %356 : vector<8x32xf32>
    %358 = vector.extract_strided_slice %352 {offsets = [0, 32], sizes = [8, 32], strides = [1, 1]} : vector<8x128xf32> to vector<8x32xf32>
    %cst_148 = arith.constant 5.000000e-01 : f32
    %359 = vector.broadcast %cst_148 : f32 to vector<8x32xf32>
    %360 = arith.mulf %359, %358 : vector<8x32xf32>
    %cst_149 = arith.constant 5.000000e-01 : f32
    %361 = vector.broadcast %cst_149 : f32 to vector<8x32xf32>
    %362 = arith.addf %360, %361 : vector<8x32xf32>
    %363 = vector.extract_strided_slice %352 {offsets = [0, 64], sizes = [8, 32], strides = [1, 1]} : vector<8x128xf32> to vector<8x32xf32>
    %364 = vector.extract_strided_slice %352 {offsets = [0, 96], sizes = [8, 32], strides = [1, 1]} : vector<8x128xf32> to vector<8x32xf32>
    %cst_150 = arith.constant 5.000000e-01 : f32
    %365 = vector.broadcast %cst_150 : f32 to vector<8x32xf32>
    %366 = arith.mulf %365, %364 : vector<8x32xf32>
    %cst_151 = arith.constant 5.000000e-01 : f32
    %367 = vector.broadcast %cst_151 : f32 to vector<8x32xf32>
    %368 = arith.addf %366, %367 : vector<8x32xf32>
    %369 = arith.mulf %362, %343 : vector<8x32xf32>
    %370 = arith.mulf %357, %363 : vector<8x32xf32>
    %371 = arith.addf %369, %370 : vector<8x32xf32>
    %372 = math.tanh %371 : vector<8x32xf32>
    %373 = arith.mulf %368, %372 : vector<8x32xf32>
    %c3_i32_152 = arith.constant 3 : i32
    %374 = arith.index_cast %c3_i32_152 : i32 to index
    %c0_153 = arith.constant 0 : index
    %c0_154 = arith.constant 0 : index
    %375 = vector.load %arg13[%374, %c0_153, %c0_154] : memref<8x8x128xf32, #tpu.memory_space<vmem>>, vector<1x8x128xf32>
    %376 = vector.shape_cast %375 : vector<1x8x128xf32> to vector<8x128xf32>
    %377 = arith.truncf %373 : vector<8x32xf32> to vector<8x32xbf16>
    %cst_155 = arith.constant dense<0.000000e+00> : vector<8x128xf32>
    %378 = tpu.matmul %377, %4, %cst_155 {dimension_numbers = #tpu.dot_dimension_numbers<[1], [0], [0], [1], [0, 0, 1, 1], [], []>} : vector<8x32xbf16>, vector<32x128xbf16>, vector<8x128xf32> -> vector<8x128xf32>
    %379 = arith.addf %376, %378 : vector<8x128xf32>
    %380 = math.tanh %379 : vector<8x128xf32>
    %381 = vector.extract_strided_slice %380 {offsets = [0, 0], sizes = [8, 32], strides = [1, 1]} : vector<8x128xf32> to vector<8x32xf32>
    %cst_156 = arith.constant 5.000000e-01 : f32
    %382 = vector.broadcast %cst_156 : f32 to vector<8x32xf32>
    %383 = arith.mulf %382, %381 : vector<8x32xf32>
    %cst_157 = arith.constant 5.000000e-01 : f32
    %384 = vector.broadcast %cst_157 : f32 to vector<8x32xf32>
    %385 = arith.addf %383, %384 : vector<8x32xf32>
    %386 = vector.extract_strided_slice %380 {offsets = [0, 32], sizes = [8, 32], strides = [1, 1]} : vector<8x128xf32> to vector<8x32xf32>
    %cst_158 = arith.constant 5.000000e-01 : f32
    %387 = vector.broadcast %cst_158 : f32 to vector<8x32xf32>
    %388 = arith.mulf %387, %386 : vector<8x32xf32>
    %cst_159 = arith.constant 5.000000e-01 : f32
    %389 = vector.broadcast %cst_159 : f32 to vector<8x32xf32>
    %390 = arith.addf %388, %389 : vector<8x32xf32>
    %391 = vector.extract_strided_slice %380 {offsets = [0, 64], sizes = [8, 32], strides = [1, 1]} : vector<8x128xf32> to vector<8x32xf32>
    %392 = vector.extract_strided_slice %380 {offsets = [0, 96], sizes = [8, 32], strides = [1, 1]} : vector<8x128xf32> to vector<8x32xf32>
    %cst_160 = arith.constant 5.000000e-01 : f32
    %393 = vector.broadcast %cst_160 : f32 to vector<8x32xf32>
    %394 = arith.mulf %393, %392 : vector<8x32xf32>
    %cst_161 = arith.constant 5.000000e-01 : f32
    %395 = vector.broadcast %cst_161 : f32 to vector<8x32xf32>
    %396 = arith.addf %394, %395 : vector<8x32xf32>
    %397 = arith.mulf %390, %371 : vector<8x32xf32>
    %398 = arith.mulf %385, %391 : vector<8x32xf32>
    %399 = arith.addf %397, %398 : vector<8x32xf32>
    %400 = math.tanh %399 : vector<8x32xf32>
    %401 = arith.mulf %396, %400 : vector<8x32xf32>
    %c4_i32_162 = arith.constant 4 : i32
    %402 = arith.index_cast %c4_i32_162 : i32 to index
    %c0_163 = arith.constant 0 : index
    %c0_164 = arith.constant 0 : index
    %403 = vector.load %arg13[%402, %c0_163, %c0_164] : memref<8x8x128xf32, #tpu.memory_space<vmem>>, vector<1x8x128xf32>
    %404 = vector.shape_cast %403 : vector<1x8x128xf32> to vector<8x128xf32>
    %405 = arith.truncf %401 : vector<8x32xf32> to vector<8x32xbf16>
    %cst_165 = arith.constant dense<0.000000e+00> : vector<8x128xf32>
    %406 = tpu.matmul %405, %4, %cst_165 {dimension_numbers = #tpu.dot_dimension_numbers<[1], [0], [0], [1], [0, 0, 1, 1], [], []>} : vector<8x32xbf16>, vector<32x128xbf16>, vector<8x128xf32> -> vector<8x128xf32>
    %407 = arith.addf %404, %406 : vector<8x128xf32>
    %408 = math.tanh %407 : vector<8x128xf32>
    %409 = vector.extract_strided_slice %408 {offsets = [0, 0], sizes = [8, 32], strides = [1, 1]} : vector<8x128xf32> to vector<8x32xf32>
    %cst_166 = arith.constant 5.000000e-01 : f32
    %410 = vector.broadcast %cst_166 : f32 to vector<8x32xf32>
    %411 = arith.mulf %410, %409 : vector<8x32xf32>
    %cst_167 = arith.constant 5.000000e-01 : f32
    %412 = vector.broadcast %cst_167 : f32 to vector<8x32xf32>
    %413 = arith.addf %411, %412 : vector<8x32xf32>
    %414 = vector.extract_strided_slice %408 {offsets = [0, 32], sizes = [8, 32], strides = [1, 1]} : vector<8x128xf32> to vector<8x32xf32>
    %cst_168 = arith.constant 5.000000e-01 : f32
    %415 = vector.broadcast %cst_168 : f32 to vector<8x32xf32>
    %416 = arith.mulf %415, %414 : vector<8x32xf32>
    %cst_169 = arith.constant 5.000000e-01 : f32
    %417 = vector.broadcast %cst_169 : f32 to vector<8x32xf32>
    %418 = arith.addf %416, %417 : vector<8x32xf32>
    %419 = vector.extract_strided_slice %408 {offsets = [0, 64], sizes = [8, 32], strides = [1, 1]} : vector<8x128xf32> to vector<8x32xf32>
    %420 = vector.extract_strided_slice %408 {offsets = [0, 96], sizes = [8, 32], strides = [1, 1]} : vector<8x128xf32> to vector<8x32xf32>
    %cst_170 = arith.constant 5.000000e-01 : f32
    %421 = vector.broadcast %cst_170 : f32 to vector<8x32xf32>
    %422 = arith.mulf %421, %420 : vector<8x32xf32>
    %cst_171 = arith.constant 5.000000e-01 : f32
    %423 = vector.broadcast %cst_171 : f32 to vector<8x32xf32>
    %424 = arith.addf %422, %423 : vector<8x32xf32>
    %425 = arith.mulf %418, %399 : vector<8x32xf32>
    %426 = arith.mulf %413, %419 : vector<8x32xf32>
    %427 = arith.addf %425, %426 : vector<8x32xf32>
    %428 = math.tanh %427 : vector<8x32xf32>
    %429 = arith.mulf %424, %428 : vector<8x32xf32>
    %c5_i32_172 = arith.constant 5 : i32
    %430 = arith.index_cast %c5_i32_172 : i32 to index
    %c0_173 = arith.constant 0 : index
    %c0_174 = arith.constant 0 : index
    %431 = vector.load %arg13[%430, %c0_173, %c0_174] : memref<8x8x128xf32, #tpu.memory_space<vmem>>, vector<1x8x128xf32>
    %432 = vector.shape_cast %431 : vector<1x8x128xf32> to vector<8x128xf32>
    %433 = arith.truncf %429 : vector<8x32xf32> to vector<8x32xbf16>
    %cst_175 = arith.constant dense<0.000000e+00> : vector<8x128xf32>
    %434 = tpu.matmul %433, %4, %cst_175 {dimension_numbers = #tpu.dot_dimension_numbers<[1], [0], [0], [1], [0, 0, 1, 1], [], []>} : vector<8x32xbf16>, vector<32x128xbf16>, vector<8x128xf32> -> vector<8x128xf32>
    %435 = arith.addf %432, %434 : vector<8x128xf32>
    %436 = math.tanh %435 : vector<8x128xf32>
    %437 = vector.extract_strided_slice %436 {offsets = [0, 0], sizes = [8, 32], strides = [1, 1]} : vector<8x128xf32> to vector<8x32xf32>
    %cst_176 = arith.constant 5.000000e-01 : f32
    %438 = vector.broadcast %cst_176 : f32 to vector<8x32xf32>
    %439 = arith.mulf %438, %437 : vector<8x32xf32>
    %cst_177 = arith.constant 5.000000e-01 : f32
    %440 = vector.broadcast %cst_177 : f32 to vector<8x32xf32>
    %441 = arith.addf %439, %440 : vector<8x32xf32>
    %442 = vector.extract_strided_slice %436 {offsets = [0, 32], sizes = [8, 32], strides = [1, 1]} : vector<8x128xf32> to vector<8x32xf32>
    %cst_178 = arith.constant 5.000000e-01 : f32
    %443 = vector.broadcast %cst_178 : f32 to vector<8x32xf32>
    %444 = arith.mulf %443, %442 : vector<8x32xf32>
    %cst_179 = arith.constant 5.000000e-01 : f32
    %445 = vector.broadcast %cst_179 : f32 to vector<8x32xf32>
    %446 = arith.addf %444, %445 : vector<8x32xf32>
    %447 = vector.extract_strided_slice %436 {offsets = [0, 64], sizes = [8, 32], strides = [1, 1]} : vector<8x128xf32> to vector<8x32xf32>
    %448 = vector.extract_strided_slice %436 {offsets = [0, 96], sizes = [8, 32], strides = [1, 1]} : vector<8x128xf32> to vector<8x32xf32>
    %cst_180 = arith.constant 5.000000e-01 : f32
    %449 = vector.broadcast %cst_180 : f32 to vector<8x32xf32>
    %450 = arith.mulf %449, %448 : vector<8x32xf32>
    %cst_181 = arith.constant 5.000000e-01 : f32
    %451 = vector.broadcast %cst_181 : f32 to vector<8x32xf32>
    %452 = arith.addf %450, %451 : vector<8x32xf32>
    %453 = arith.mulf %446, %427 : vector<8x32xf32>
    %454 = arith.mulf %441, %447 : vector<8x32xf32>
    %455 = arith.addf %453, %454 : vector<8x32xf32>
    %456 = math.tanh %455 : vector<8x32xf32>
    %457 = arith.mulf %452, %456 : vector<8x32xf32>
    %c6_i32_182 = arith.constant 6 : i32
    %458 = arith.index_cast %c6_i32_182 : i32 to index
    %c0_183 = arith.constant 0 : index
    %c0_184 = arith.constant 0 : index
    %459 = vector.load %arg13[%458, %c0_183, %c0_184] : memref<8x8x128xf32, #tpu.memory_space<vmem>>, vector<1x8x128xf32>
    %460 = vector.shape_cast %459 : vector<1x8x128xf32> to vector<8x128xf32>
    %461 = arith.truncf %457 : vector<8x32xf32> to vector<8x32xbf16>
    %cst_185 = arith.constant dense<0.000000e+00> : vector<8x128xf32>
    %462 = tpu.matmul %461, %4, %cst_185 {dimension_numbers = #tpu.dot_dimension_numbers<[1], [0], [0], [1], [0, 0, 1, 1], [], []>} : vector<8x32xbf16>, vector<32x128xbf16>, vector<8x128xf32> -> vector<8x128xf32>
    %463 = arith.addf %460, %462 : vector<8x128xf32>
    %464 = math.tanh %463 : vector<8x128xf32>
    %465 = vector.extract_strided_slice %464 {offsets = [0, 0], sizes = [8, 32], strides = [1, 1]} : vector<8x128xf32> to vector<8x32xf32>
    %cst_186 = arith.constant 5.000000e-01 : f32
    %466 = vector.broadcast %cst_186 : f32 to vector<8x32xf32>
    %467 = arith.mulf %466, %465 : vector<8x32xf32>
    %cst_187 = arith.constant 5.000000e-01 : f32
    %468 = vector.broadcast %cst_187 : f32 to vector<8x32xf32>
    %469 = arith.addf %467, %468 : vector<8x32xf32>
    %470 = vector.extract_strided_slice %464 {offsets = [0, 32], sizes = [8, 32], strides = [1, 1]} : vector<8x128xf32> to vector<8x32xf32>
    %cst_188 = arith.constant 5.000000e-01 : f32
    %471 = vector.broadcast %cst_188 : f32 to vector<8x32xf32>
    %472 = arith.mulf %471, %470 : vector<8x32xf32>
    %cst_189 = arith.constant 5.000000e-01 : f32
    %473 = vector.broadcast %cst_189 : f32 to vector<8x32xf32>
    %474 = arith.addf %472, %473 : vector<8x32xf32>
    %475 = vector.extract_strided_slice %464 {offsets = [0, 64], sizes = [8, 32], strides = [1, 1]} : vector<8x128xf32> to vector<8x32xf32>
    %476 = vector.extract_strided_slice %464 {offsets = [0, 96], sizes = [8, 32], strides = [1, 1]} : vector<8x128xf32> to vector<8x32xf32>
    %cst_190 = arith.constant 5.000000e-01 : f32
    %477 = vector.broadcast %cst_190 : f32 to vector<8x32xf32>
    %478 = arith.mulf %477, %476 : vector<8x32xf32>
    %cst_191 = arith.constant 5.000000e-01 : f32
    %479 = vector.broadcast %cst_191 : f32 to vector<8x32xf32>
    %480 = arith.addf %478, %479 : vector<8x32xf32>
    %481 = arith.mulf %474, %455 : vector<8x32xf32>
    %482 = arith.mulf %469, %475 : vector<8x32xf32>
    %483 = arith.addf %481, %482 : vector<8x32xf32>
    %484 = math.tanh %483 : vector<8x32xf32>
    %485 = arith.mulf %480, %484 : vector<8x32xf32>
    %c7_i32_192 = arith.constant 7 : i32
    %486 = arith.index_cast %c7_i32_192 : i32 to index
    %c0_193 = arith.constant 0 : index
    %c0_194 = arith.constant 0 : index
    %487 = vector.load %arg13[%486, %c0_193, %c0_194] : memref<8x8x128xf32, #tpu.memory_space<vmem>>, vector<1x8x128xf32>
    %488 = vector.shape_cast %487 : vector<1x8x128xf32> to vector<8x128xf32>
    %489 = arith.truncf %485 : vector<8x32xf32> to vector<8x32xbf16>
    %cst_195 = arith.constant dense<0.000000e+00> : vector<8x128xf32>
    %490 = tpu.matmul %489, %4, %cst_195 {dimension_numbers = #tpu.dot_dimension_numbers<[1], [0], [0], [1], [0, 0, 1, 1], [], []>} : vector<8x32xbf16>, vector<32x128xbf16>, vector<8x128xf32> -> vector<8x128xf32>
    %491 = arith.addf %488, %490 : vector<8x128xf32>
    %492 = math.tanh %491 : vector<8x128xf32>
    %493 = vector.extract_strided_slice %492 {offsets = [0, 0], sizes = [8, 32], strides = [1, 1]} : vector<8x128xf32> to vector<8x32xf32>
    %cst_196 = arith.constant 5.000000e-01 : f32
    %494 = vector.broadcast %cst_196 : f32 to vector<8x32xf32>
    %495 = arith.mulf %494, %493 : vector<8x32xf32>
    %cst_197 = arith.constant 5.000000e-01 : f32
    %496 = vector.broadcast %cst_197 : f32 to vector<8x32xf32>
    %497 = arith.addf %495, %496 : vector<8x32xf32>
    %498 = vector.extract_strided_slice %492 {offsets = [0, 32], sizes = [8, 32], strides = [1, 1]} : vector<8x128xf32> to vector<8x32xf32>
    %cst_198 = arith.constant 5.000000e-01 : f32
    %499 = vector.broadcast %cst_198 : f32 to vector<8x32xf32>
    %500 = arith.mulf %499, %498 : vector<8x32xf32>
    %cst_199 = arith.constant 5.000000e-01 : f32
    %501 = vector.broadcast %cst_199 : f32 to vector<8x32xf32>
    %502 = arith.addf %500, %501 : vector<8x32xf32>
    %503 = vector.extract_strided_slice %492 {offsets = [0, 64], sizes = [8, 32], strides = [1, 1]} : vector<8x128xf32> to vector<8x32xf32>
    %504 = vector.extract_strided_slice %492 {offsets = [0, 96], sizes = [8, 32], strides = [1, 1]} : vector<8x128xf32> to vector<8x32xf32>
    %cst_200 = arith.constant 5.000000e-01 : f32
    %505 = vector.broadcast %cst_200 : f32 to vector<8x32xf32>
    %506 = arith.mulf %505, %504 : vector<8x32xf32>
    %cst_201 = arith.constant 5.000000e-01 : f32
    %507 = vector.broadcast %cst_201 : f32 to vector<8x32xf32>
    %508 = arith.addf %506, %507 : vector<8x32xf32>
    %509 = arith.mulf %502, %483 : vector<8x32xf32>
    %510 = arith.mulf %497, %503 : vector<8x32xf32>
    %511 = arith.addf %509, %510 : vector<8x32xf32>
    %512 = math.tanh %511 : vector<8x32xf32>
    %513 = arith.mulf %508, %512 : vector<8x32xf32>
    %c8_i32_202 = arith.constant 8 : i32
    %514 = arith.truncf %513 : vector<8x32xf32> to vector<8x32xbf16>
    %cst_203 = arith.constant dense<0.000000e+00> : vector<8x128xf32>
    %515 = tpu.matmul %514, %6, %cst_203 {dimension_numbers = #tpu.dot_dimension_numbers<[1], [0], [0], [1], [0, 0, 1, 1], [], []>} : vector<8x32xbf16>, vector<32x128xbf16>, vector<8x128xf32> -> vector<8x128xf32>
    %516 = vector.broadcast %7 : vector<1x128xf32> to vector<8x128xf32>
    %517 = arith.addf %515, %516 : vector<8x128xf32>
    %cst_204 = arith.constant 0.000000e+00 : f32
    %518 = vector.broadcast %cst_204 : f32 to vector<8x128xf32>
    %519 = arith.maximumf %517, %518 : vector<8x128xf32>
    %520 = arith.truncf %519 : vector<8x128xf32> to vector<8x128xbf16>
    %cst_205 = arith.constant dense<0.000000e+00> : vector<8x128xf32>
    %521 = tpu.matmul %520, %8, %cst_205 {dimension_numbers = #tpu.dot_dimension_numbers<[1], [0], [0], [1], [0, 0, 1, 1], [], []>} : vector<8x128xbf16>, vector<128x128xbf16>, vector<8x128xf32> -> vector<8x128xf32>
    %522 = vector.broadcast %9 : vector<1x128xf32> to vector<8x128xf32>
    %523 = arith.addf %521, %522 : vector<8x128xf32>
    %cst_206 = arith.constant dense<0xFF800000> : vector<8xf32>
    %524 = vector.multi_reduction <maximumf>, %523, %cst_206 [1] : vector<8x128xf32> to vector<8xf32>
    %525 = vector.shape_cast %524 : vector<8xf32> to vector<8x1xf32>
    %526 = vector.broadcast %525 : vector<8x1xf32> to vector<8x128xf32>
    %527 = arith.subf %523, %526 : vector<8x128xf32>
    %528 = math.exp %527 : vector<8x128xf32>
    %cst_207 = arith.constant dense<0.000000e+00> : vector<8xf32>
    %529 = vector.multi_reduction <add>, %528, %cst_207 [1] : vector<8x128xf32> to vector<8xf32>
    %530 = vector.shape_cast %529 : vector<8xf32> to vector<8x1xf32>
    %531 = vector.broadcast %530 : vector<8x1xf32> to vector<8x128xf32>
    %532 = arith.divf %528, %531 : vector<8x128xf32>
    %c0_208 = arith.constant 0 : index
    %c0_209 = arith.constant 0 : index
    %533 = vector.load %arg12[%c0_208, %c0_209] : memref<8x128xf32, #tpu.memory_space<vmem>>, vector<8x128xf32>
    tpu.vector_store %arg12[%c0_208, %c0_209], %532 {strides = array<i32>} : memref<8x128xf32, #tpu.memory_space<vmem>>, vector<8x128xf32>,
    return
  }
  func.func @transform_0(%arg0: i32) -> (i32, i32, i32) {
    %c0_i32 = arith.constant 0 : i32
    %c0_i32_0 = arith.constant 0 : i32
    %c0_i32_1 = arith.constant 0 : i32
    return %c0_i32, %arg0, %c0_i32_0 : i32, i32, i32
  }
  func.func @transform_1(%arg0: i32) -> (i32, i32) {
    %c0_i32 = arith.constant 0 : i32
    %c0_i32_0 = arith.constant 0 : i32
    %c0_i32_1 = arith.constant 0 : i32
    return %c0_i32, %c0_i32_0 : i32, i32
  }
  func.func @transform_2(%arg0: i32) -> (i32, i32) {
    %c0_i32 = arith.constant 0 : i32
    %c0_i32_0 = arith.constant 0 : i32
    %c0_i32_1 = arith.constant 0 : i32
    return %c0_i32, %c0_i32_0 : i32, i32
  }
  func.func @transform_3(%arg0: i32) -> (i32, i32) {
    %c0_i32 = arith.constant 0 : i32
    %c0_i32_0 = arith.constant 0 : i32
    %c0_i32_1 = arith.constant 0 : i32
    return %c0_i32, %c0_i32_0 : i32, i32
  }
  func.func @transform_4(%arg0: i32) -> (i32, i32) {
    %c0_i32 = arith.constant 0 : i32
    %c0_i32_0 = arith.constant 0 : i32
    %c0_i32_1 = arith.constant 0 : i32
    return %c0_i32, %c0_i32_0 : i32, i32
  }
  func.func @transform_5(%arg0: i32) -> (i32, i32) {
    %c0_i32 = arith.constant 0 : i32
    %c0_i32_0 = arith.constant 0 : i32
    %c0_i32_1 = arith.constant 0 : i32
    return %c0_i32, %c0_i32_0 : i32, i32
  }
  func.func @transform_6(%arg0: i32) -> (i32, i32) {
    %c0_i32 = arith.constant 0 : i32
    %c0_i32_0 = arith.constant 0 : i32
    %c0_i32_1 = arith.constant 0 : i32
    return %c0_i32, %c0_i32_0 : i32, i32
  }
  func.func @transform_7(%arg0: i32) -> (i32, i32) {
    %c0_i32 = arith.constant 0 : i32
    %c0_i32_0 = arith.constant 0 : i32
    %c0_i32_1 = arith.constant 0 : i32
    return %c0_i32, %c0_i32_0 : i32, i32
  }
  func.func @transform_8(%arg0: i32) -> (i32, i32) {
    %c0_i32 = arith.constant 0 : i32
    %c0_i32_0 = arith.constant 0 : i32
    %c0_i32_1 = arith.constant 0 : i32
    return %c0_i32, %c0_i32_0 : i32, i32
  }
  func.func @transform_9(%arg0: i32) -> (i32, i32) {
    %c0_i32 = arith.constant 0 : i32
    %c0_i32_0 = arith.constant 0 : i32
    %c0_i32_1 = arith.constant 0 : i32
    return %c0_i32, %c0_i32_0 : i32, i32
  }
  func.func @transform_10(%arg0: i32) -> (i32, i32) {
    %c0_i32 = arith.constant 0 : i32
    %c0_i32_0 = arith.constant 0 : i32
    %c0_i32_1 = arith.constant 0 : i32
    return %c0_i32, %c0_i32_0 : i32, i32
  }
  func.func @transform_11(%arg0: i32) -> (i32, i32) {
    %c0_i32 = arith.constant 0 : i32
    %c0_i32_0 = arith.constant 0 : i32
    return %arg0, %c0_i32 : i32, i32
  }
}

</mosaic_0001>

<bundles_post_ra>
// kernel: tpu_custom_call.1
= control target key start
LH: loop header
LB: loop body
LE: loop exit
PB: predicated region body
PF: predicated region fallthrough
CT: control target
= control target key end

     0   :  { %16 = vsyncpa [#allocation5], 0  ;;  %s2939_s0 = inlined_call_operand.hbm [shape: bf16[8,8,64], index: 0, kind: input, shape index: {}]   ;;  %s2940_s1 = inlined_call_operand.hbm [shape: bf16[64,128], index: 1, kind: input, shape index: {}]   ;;  %s2941_s2 = inlined_call_operand.hbm [shape: bf16[32,128], index: 2, kind: input, shape index: {}]   ;;  %s2942_s3 = inlined_call_operand.vmem [shape: f32[1,128], index: 3, kind: input, shape index: {}]   ;;  %s2943_s4 = inlined_call_operand.hbm [shape: bf16[32,128], index: 4, kind: input, shape index: {}]   ;;  %s2944_s5 = inlined_call_operand.vmem [shape: bf16[32,128], index: 5, kind: input, shape index: {}]   ;;  %s2945_s6 = inlined_call_operand.vmem [shape: f32[1,128], index: 6, kind: input, shape index: {}]   ;;  %s2946_s7 = inlined_call_operand.hbm [shape: bf16[32,128], index: 7, kind: input, shape index: {}]   ;;  %s2947_s8 = inlined_call_operand.vmem [shape: f32[1,128], index: 8, kind: input, shape index: {}]   ;;  %s2948_s9 = inlined_call_operand.hbm [shape: bf16[128,128], index: 9, kind: input, shape index: {}]   ;;  %s2949_s10 = inlined_call_operand.vmem [shape: f32[1,128], index: 10, kind: input, shape index: {}]   ;;  %s2950_s11 = inlined_call_operand.hbm [shape: f32[8,128], index: 11, kind: output, shape index: {}]  }
   0x1   :  { %17 = vsyncpa [#allocation8], 0 }
   0x2   :  { %18 = vsyncpa [#allocation11], 0 }
   0x3   :  { %19 = vsyncpa [#allocation14], 0 }
   0x4   :  { %20 = vsyncpa [#allocation6], 0  ;;  %s2415_s17 = smov [#allocation7]   ;;  %s2416_s19 = smov [#allocation10]  }
   0x5   :  { %s38_s18 = sshll.u32 %s2415_s17, 4  ;;  %s64_s20 = sshll.u32 %s2416_s19, 4  ;;  %s39_s18 = int_to_ptr.vmem [resolvable:$true] %s38_s18  ;;  %s2488_s20 = int_to_ptr.vmem [resolvable:$true] %s64_s20 }
   0x6   :  { %s2251_s23 = scalar_lea.hbm %s2940_s1, 512 }
   0x7   :  { %p2252_p0 = scmp.ne.s32.totalorder %s2940_s1, %s2251_s23  ;;  %p2255_p1 = scmp.lt.u32.totalorder %s2251_s23, %s2940_s1 }
   0x9   :  { %p2257_p2 = pnand %p2255_p1, %p2252_p0 }
   0xb   :  { %2260 = shalt.err (!%p2257_p2)
}
   0xc   :  { %s2261_s28 = scalar_lea.vmem %s39_s18, 512  ;;  %p2266_p4 = scmp.lt.s32.totalorder %s39_s18, %s39_s18 }
   0xd   :  { %p2262_p3 = scmp.ne.s32.totalorder %s39_s18, %s2261_s28  ;;  %p2267_p5 = scmp.lt.s32.totalorder %s2261_s28, %s2261_s28 }
   0xf   :  { %p2268_p6 = por %p2267_p5, %p2266_p4 }
  0x11   :  { %p2269_p7 = pnand %p2268_p6, %p2262_p3 }
  0x13   :  { %2272 = shalt.err (!%p2269_p7)
}
  0x14   :  { %s2417_s29 = smov 64   ;;  %s2418_s30 = smov 4  }
  0x15   :  { %44 = dma.hbm_to_vmem [thread:$0]  %s2940_s1, 512, %s39_s18, [#allocation8], %s2417_s29, %s2417_s29, %s2418_s30  }
  0x16   :  { %s2273_s16 = scalar_lea.hbm %s2943_s4, 256 }
  0x17   :  { %p2274_p8 = scmp.ne.s32.totalorder %s2943_s4, %s2273_s16  ;;  %p2277_p9 = scmp.lt.u32.totalorder %s2273_s16, %s2943_s4 }
  0x19   :  { %p2279_p10 = pnand %p2277_p9, %p2274_p8 }
  0x1b   :  { %2282 = shalt.err (!%p2279_p10)
}
  0x1c   :  { %s2283_s23 = scalar_lea.vmem %s2488_s20, 256  ;;  %p2288_p12 = scmp.lt.s32.totalorder %s2488_s20, %s2488_s20 }
  0x1d   :  { %p2284_p11 = scmp.ne.s32.totalorder %s2488_s20, %s2283_s23  ;;  %p2289_p13 = scmp.lt.s32.totalorder %s2283_s23, %s2283_s23 }
  0x1f   :  { %p2290_p0 = por %p2289_p13, %p2288_p12 }
  0x21   :  { %p2291_p1 = pnand %p2290_p0, %p2284_p11 }
  0x23   :  { %2294 = shalt.err (!%p2291_p1)
}
  0x24   :  { %70 = dma.hbm_to_vmem [thread:$0]  %s2943_s4, 256, %s2488_s20, [#allocation11], %s2417_s29, %s2417_s29, %s2418_s30  }
  0x25   :  { %s2419_s24 = smov [#allocation4]   ;;  %s2420_s26 = smov [#allocation9]  }
  0x26   :  { %s26_s25 = sshll.u32 %s2419_s24, 4  ;;  %s50_s27 = sshll.u32 %s2420_s26, 4  ;;  %s27_s25 = int_to_ptr.vmem [resolvable:$true] %s26_s25  ;;  %s2525_s27 = int_to_ptr.vmem [resolvable:$true] %s50_s27 }
  0x27   :  { %s2295_s13 = scalar_lea.hbm %s2939_s0, 512 }
  0x28   :  { %p2296_p2 = scmp.ne.s32.totalorder %s2939_s0, %s2295_s13  ;;  %p2299_p3 = scmp.lt.u32.totalorder %s2295_s13, %s2939_s0 }
  0x2a   :  { %p2301_p4 = pnand %p2299_p3, %p2296_p2 }
  0x2c   :  { %2304 = shalt.err (!%p2301_p4)
}
  0x2d   :  { %s2305_s4 = scalar_lea.vmem %s27_s25, 512  ;;  %p2310_p6 = scmp.lt.s32.totalorder %s27_s25, %s27_s25 }
  0x2e   :  { %p2306_p5 = scmp.ne.s32.totalorder %s27_s25, %s2305_s4  ;;  %p2311_p7 = scmp.lt.s32.totalorder %s2305_s4, %s2305_s4 }
  0x30   :  { %p2312_p8 = por %p2311_p7, %p2310_p6 }
  0x32   :  { %p2313_p9 = pnand %p2312_p8, %p2306_p5 }
  0x34   :  { %2316 = shalt.err (!%p2313_p9)
}
  0x35   :  { %32 = dma.hbm_to_vmem [thread:$0]  %s2939_s0, 512, %s27_s25, [#allocation5], %s2417_s29, %s2417_s29, %s2418_s30  }
  0x36   :  { %s2317_s23 = scalar_lea.hbm %s2941_s2, 256 }
  0x37   :  { %p2318_p10 = scmp.ne.s32.totalorder %s2941_s2, %s2317_s23  ;;  %p2321_p11 = scmp.lt.u32.totalorder %s2317_s23, %s2941_s2 }
  0x39   :  { %p2323_p12 = pnand %p2321_p11, %p2318_p10 }
  0x3b   :  { %2326 = shalt.err (!%p2323_p12)
}
  0x3c   :  { %s2327_s28 = scalar_lea.vmem %s2525_s27, 256  ;;  %p2332_p0 = scmp.lt.s32.totalorder %s2525_s27, %s2525_s27 }
  0x3d   :  { %p2328_p13 = scmp.ne.s32.totalorder %s2525_s27, %s2327_s28  ;;  %p2333_p1 = scmp.lt.s32.totalorder %s2327_s28, %s2327_s28 }
  0x3f   :  { %p2334_p2 = por %p2333_p1, %p2332_p0 }
  0x41   :  { %p2335_p3 = pnand %p2334_p2, %p2328_p13 }
  0x43   :  { %2338 = shalt.err (!%p2335_p3)
}
  0x44   :  { %56 = dma.hbm_to_vmem [thread:$0]  %s2941_s2, 256, %s2525_s27, [#allocation8], %s2417_s29, %s2417_s29, %s2418_s30  }
  0x45   :  { %s2421_s12 = smov [#allocation12]   ;;  %s2422_s14 = smov [#allocation13]  }
  0x46   :  { %s80_s13 = sshll.u32 %s2421_s12, 4  ;;  %s94_s15 = sshll.u32 %s2422_s14, 4  ;;  %s81_s13 = int_to_ptr.vmem [resolvable:$true] %s80_s13  ;;  %s2562_s15 = int_to_ptr.vmem [resolvable:$true] %s94_s15 }
  0x47   :  { %s2339_s4 = scalar_lea.hbm %s2946_s7, 256 }
  0x48   :  { %p2340_p4 = scmp.ne.s32.totalorder %s2946_s7, %s2339_s4  ;;  %p2343_p5 = scmp.lt.u32.totalorder %s2339_s4, %s2946_s7 }
  0x4a   :  { %p2345_p6 = pnand %p2343_p5, %p2340_p4 }
  0x4c   :  { %2348 = shalt.err (!%p2345_p6)
}
  0x4d   :  { %s2349_s2 = scalar_lea.vmem %s81_s13, 256  ;;  %p2354_p8 = scmp.lt.s32.totalorder %s81_s13, %s81_s13 }
  0x4e   :  { %p2350_p7 = scmp.ne.s32.totalorder %s81_s13, %s2349_s2  ;;  %p2355_p9 = scmp.lt.s32.totalorder %s2349_s2, %s2349_s2 }
  0x50   :  { %p2356_p10 = por %p2355_p9, %p2354_p8 }
  0x52   :  { %p2357_p11 = pnand %p2356_p10, %p2350_p7 }
  0x54   :  { %2360 = shalt.err (!%p2357_p11)
}
  0x55   :  { %86 = dma.hbm_to_vmem [thread:$0]  %s2946_s7, 256, %s81_s13, [#allocation11], %s2417_s29, %s2417_s29, %s2418_s30  }
  0x56   :  { %s2361_s24 = scalar_lea.hbm %s2948_s9, 1024 }
  0x57   :  { %p2362_p12 = scmp.ne.s32.totalorder %s2948_s9, %s2361_s24  ;;  %p2365_p13 = scmp.lt.u32.totalorder %s2361_s24, %s2948_s9 }
  0x59   :  { %p2367_p0 = pnand %p2365_p13, %p2362_p12 }
  0x5b   :  { %2370 = shalt.err (!%p2367_p0)
}
  0x5c   :  { %s2371_s12 = scalar_lea.vmem %s2562_s15, 1024  ;;  %p2376_p2 = scmp.lt.s32.totalorder %s2562_s15, %s2562_s15 }
  0x5d   :  { %p2372_p1 = scmp.ne.s32.totalorder %s2562_s15, %s2371_s12  ;;  %p2377_p3 = scmp.lt.s32.totalorder %s2371_s12, %s2371_s12 }
  0x5f   :  { %p2378_p4 = por %p2377_p3, %p2376_p2 }
  0x61   :  { %p2379_p5 = pnand %p2378_p4, %p2372_p1 }
  0x63   :  { %2382 = shalt.err (!%p2379_p5)
}
  0x64   :  { %100 = dma.hbm_to_vmem [thread:$0]  %s2948_s9, 1024, %s2562_s15, [#allocation14], %s2417_s29, %s2417_s29, %s2418_s30  }
  0x65   :  { %2405 = dma.done.wait [#allocation5], 512  }
  0x66   :  { %2406 = vsyncadd [#allocation5], 4294966784 }
  0x67   :  { %2407 = dma.done.wait [#allocation8], 768  }
  0x68   :  { %2408 = vsyncadd [#allocation8], 4294966528 }
  0x69   :  { %2409 = dma.done.wait [#allocation11], 512  }
  0x6a   :  { %2410 = vsyncadd [#allocation11], 4294966784 }
  0x6b   :  { %2411 = dma.done.wait [#allocation14], 1024  }
  0x6c   :  { %2412 = vsyncadd [#allocation14], 4294966272  ;;  %v2423_v0 = vmov 0.0   ;;  %vm2424_vm0 = vmmov 0   ;;  %v2155_v1 = vld [vmem:[#allocation7] sm:$0xff]   ;;  %v2156_v2 = vld [vmem:[#allocation7 + $0x8] sm:$0xff]  }
  0x6d   :  { %1974 = vmatprep.subr.bf16.mxu0 %v2423_v0  ;;  %1978 = vmatprep.mubr.msk.bf16.mxu0 %vm2424_vm0, %v2423_v0  ;;  %v2602_v3 = vld [vmem:[#allocation9] sm:$0xff]   ;;  %v2157_v4 = vld [vmem:[#allocation7 + $0x10] sm:$0xff]   ;;  %v2605_v5 = vld [vmem:[#allocation9 + $0x8] sm:$0xff]   ;;  %vm224_vm1 = vcmask 523264   ;;  %v2425_v9 = vmov 0   ;;  %s2426_s14 = smov 32  }
  0x6e   :  { %1958 = vmatprep.subr.bf16.mxu1 %v2155_v1  ;;  %1975 = vmatpush3.bf16.msra.mxu0 %v2602_v3  ;;  %v2161_v6 = vld [vmem:[#allocation4] sm:$0xff]   ;;  %v2159_v7 = vld [vmem:[#allocation7 + $0x18] sm:$0xff]   ;;  %v2162_v8 = vld [vmem:[#allocation4 + $0x8] sm:$0xff]   ;;  %vm323_vm2 = vcmask 261120   ;;  %vm395_vm3 = vcmask 257024  }
  0x6f   :  { %1959 = vmatpush3.bf16.msra.mxu1 %v2155_v1  ;;  %1976 = vmatprep.subr.bf16.mxu0 %v2423_v0  ;;  %v2627_v14 = vld [vmem:[%s2942_s3] ss:$0 sm:$0xff]  ;;  %v2163_v29 = vld [vmem:[#allocation4 + $0x10] sm:$0xff]   ;;  %v2164_v30 = vld [vmem:[#allocation4 + $0x18] sm:$0xff]  }
  0x70   :  { %1960 = vmatprep.subr.bf16.mxu1 %v2156_v2  ;;  %1966 = vmatprep.mubr.msk.bf16.mxu1 %vm224_vm1, %v2161_v6 }
  0x72   :  { %1977 = vmatpush3.bf16.msra.mxu0 %v2605_v5 }
  0x73   :  { %1961 = vmatpush3.bf16.msra.mxu1 %v2156_v2  ;;  %1998 = vmatprep.subr.bf16.mxu0 %v2423_v0 }
  0x74   :  { %1962 = vmatprep.subr.bf16.mxu1 %v2157_v4 }
  0x75   :  { %1979 = vmatmul.mubr.bf16.vlgmr.msra.gmra.mrb[0].mxu0 %v2425_v9 }
  0x76   :  { %1999 = vmatpush3.bf16.msra.mxu0 %v2602_v3  ;;  %2002 = vmatprep.mubr.msk.bf16.mxu0 %vm2424_vm0, %v2423_v0 }
  0x77   :  { %1963 = vmatpush3.bf16.msra.mxu1 %v2157_v4  ;;  %2000 = vmatprep.subr.bf16.mxu0 %v2423_v0 }
  0x78   :  { %1964 = vmatprep.subr.bf16.mxu1 %v2159_v7 }
  0x7a   :  { %2001 = vmatpush3.bf16.msra.mxu0 %v2605_v5 }
  0x7b   :  { %1965 = vmatpush3.bf16.msra.mxu1 %v2159_v7  ;;  %2014 = vmatprep.subr.bf16.mxu0 %v2423_v0 }
  0x7c   :  { %1982 = vmatprep.subr.bf16.mxu1 %v2423_v0 }
  0x7e   :  { %1967 = vmatmul.mubr.msk.bf16.vlgmr.msra.gmra.mrb[0].mxu1 %vm224_vm1, %v2162_v8 }
  0x7f   :  { %1983 = vmatpush3.bf16.msra.mxu1 %v2602_v3  ;;  %1970 = vmatprep.mubr.msk.bf16.mxu1 %vm224_vm1, %v2163_v29 }
  0x80   :  { %1984 = vmatprep.subr.bf16.mxu1 %v2423_v0 }
  0x83   :  { %1985 = vmatpush3.bf16.msra.mxu1 %v2605_v5 }
  0x84   :  { %1990 = vmatprep.subr.bf16.mxu1 %v2423_v0 }
  0x86   :  { %1971 = vmatmul.mubr.msk.bf16.gmra.mrb[4].mxu1 %vm224_vm1, %v2164_v30 }
  0x87   :  { %1986 = vmatprep.mubr.msk.bf16.mxu1 %vm2424_vm0, %v2423_v0 }
 0x148   :  { %v361_v10 = vpop.f32.mrb[0].mxu0 }
 0x149   :  { %v1980_v11 = vpop.f32.mrb[1].mxu0 }
 0x14a   :  { %v364_v12 = vpop.f32.mrb[2].mxu0 }
 0x14b   :  { %v1981_v13 = vpop.f32.mrb[3].mxu0 }
 0x151   :  { %v2629_v15 = vpop.f32.mrb[0].mxu1 }
 0x152   :  { %v271_v16 = vpop.f32.mrb[1].mxu1  ;;  %v280_v59 = vadd.f32 %v2629_v15, %v2627_v14 }
 0x153   :  { %v272_v17 = vadd.f32 %v2627_v14, %v271_v16  ;;  %v2632_v18 = vpop.f32.mrb[2].mxu1 }
 0x154   :  { %v274_v19 = vpop.f32.mrb[3].mxu1 }
 0x155   :  { %v367_v20 = vadd.f32 %v361_v10, %v272_v17  ;;  %v275_v40 = vadd.f32 %v2627_v14, %v274_v19 }
 0x157   :  { %2183 = vtanh.f32 %v367_v20  ;;  %v283_v20 = vadd.f32 %v2632_v18, %v2627_v14 }
 0x159   :  { %v2645_v35 = vpop.f32.mrb[4].mxu1 }
 0x15a   :  { %v2647_v36 = vpop.f32.mrb[5].mxu1 }
 0x15b   :  { %v2649_v37 = vpop.f32.mrb[6].mxu1 }
 0x15c   :  { %v2651_v38 = vpop.f32.mrb[7].mxu1 }
 0x161   :  { %v2184_v21 = vpop.eup %2183 }
 0x162   :  { %373 = vrot.lane.b32.xlu0 %v2184_v21, %s2417_s29  ;;  %v369_v22 = vmul.f32 0.5, %v2184_v21 }
 0x164   :  { %v370_v23 = vadd.f32 0.5, %v369_v22 }
 0x166   :  { %v371_v26 = vmul.f32 0.0, %v370_v23 }
 0x1d4   :  { %v374_v24 = vpop.permute.xlu0 %373 }
 0x1d5   :  { %v376_v25 = vmul.f32 %v374_v24, %v370_v23 }
 0x1d7   :  { %378 = vrot.lane.b32.xlu0 %v376_v25, %s2426_s14 }
 0x249   :  { %v379_v27 = vpop.permute.xlu0 %378 }
 0x24a   :  { %v381_v28 = vadd.f32 %v379_v27, %v371_v26 }
 0x24c   :  { %2185 = vtanh.f32 %v381_v28 }
 0x256   :  { %v2186_v31 = vpop.eup %2185 }
 0x257   :  { %384 = vrot.lane.b32.xlu1 %v2186_v31, %s2417_s29 }
 0x2c9   :  { %v385_v32 = vpop.permute.xlu1 %384 }
 0x2ca   :  { %v387_v33 = vmul.f32 %v385_v32, %v370_v23 }
 0x2cc   :  { %v2641_v34 = vpack.c.bf16 %v387_v33, %v387_v33 }
 0x2ce   :  { %399 = vrot.lane.b32.xlu1 %v2641_v34, %s2426_s14 }
 0x340   :  { %v400_v39 = vpop.permute.xlu1 %399 }
 0x341   :  { %1987 = vmatmul.mubr.msk.bf16.vlgmr.msra.gmra.mrb[8].mxu1 %vm323_vm2, %v400_v39 }
 0x342   :  { %1991 = vmatpush3.bf16.msra.mxu1 %v2602_v3  ;;  %1994 = vmatprep.mubr.msk.bf16.mxu1 %vm2424_vm0, %v2423_v0 }
 0x343   :  { %1992 = vmatprep.subr.bf16.mxu1 %v2423_v0 }
 0x346   :  { %1993 = vmatpush3.bf16.msra.mxu1 %v2605_v5 }
 0x347   :  { %2006 = vmatprep.subr.bf16.mxu1 %v2423_v0 }
 0x414   :  { %v438_v41 = vpop.f32.mrb[8].mxu1 }
 0x415   :  { %v444_v42 = vadd.f32 %v438_v41, %v275_v40  ;;  %v1988_v43 = vpop.f32.mrb[9].mxu1 }
 0x416   :  { %v441_v44 = vpop.f32.mrb[10].mxu1  ;;  %v288_v43 = vadd.f32 %v2627_v14, %v2647_v36 }
 0x417   :  { %2187 = vtanh.f32 %v444_v42  ;;  %v1989_v45 = vpop.f32.mrb[11].mxu1 }
 0x421   :  { %v2188_v46 = vpop.eup %2187 }
 0x422   :  { %450 = vrot.lane.b32.xlu0 %v2188_v46, %s2417_s29  ;;  %v446_v47 = vmul.f32 0.5, %v2188_v46 }
 0x424   :  { %v447_v48 = vadd.f32 0.5, %v446_v47 }
 0x426   :  { %v448_v51 = vmul.f32 %v447_v48, %v381_v28 }
 0x494   :  { %v451_v49 = vpop.permute.xlu0 %450 }
 0x495   :  { %v453_v50 = vmul.f32 %v451_v49, %v447_v48 }
 0x497   :  { %455 = vrot.lane.b32.xlu1 %v453_v50, %s2426_s14 }
 0x509   :  { %v456_v52 = vpop.permute.xlu1 %455 }
 0x50a   :  { %v458_v53 = vadd.f32 %v456_v52, %v448_v51 }
 0x50c   :  { %2189 = vtanh.f32 %v458_v53 }
 0x516   :  { %v2190_v54 = vpop.eup %2189 }
 0x517   :  { %461 = vrot.lane.b32.xlu0 %v2190_v54, %s2417_s29 }
 0x589   :  { %v462_v55 = vpop.permute.xlu0 %461 }
 0x58a   :  { %v464_v56 = vmul.f32 %v462_v55, %v447_v48 }
 0x58c   :  { %v2664_v57 = vpack.c.bf16 %v464_v56, %v464_v56 }
 0x58e   :  { %476 = vrot.lane.b32.xlu1 %v2664_v57, %s2426_s14 }
 0x600   :  { %v477_v58 = vpop.permute.xlu1 %476 }
 0x601   :  { %1995 = vmatmul.mubr.msk.bf16.vlgmr.msra.gmra.mrb[12].mxu1 %vm323_vm2, %v477_v58 }
 0x602   :  { %2007 = vmatpush3.bf16.msra.mxu1 %v2602_v3  ;;  %2010 = vmatprep.mubr.msk.bf16.mxu1 %vm2424_vm0, %v2423_v0 }
 0x603   :  { %2008 = vmatprep.subr.bf16.mxu1 %v2423_v0 }
 0x606   :  { %2009 = vmatpush3.bf16.msra.mxu1 %v2605_v5 }
 0x607   :  { %2022 = vmatprep.subr.bf16.mxu1 %v2423_v0 }
 0x6d4   :  { %v515_v60 = vpop.f32.mrb[12].mxu1 }
 0x6d5   :  { %v521_v61 = vadd.f32 %v515_v60, %v280_v59  ;;  %v1996_v62 = vpop.f32.mrb[13].mxu1 }
 0x6d6   :  { %v518_v63 = vpop.f32.mrb[14].mxu1  ;;  %v291_v62 = vadd.f32 %v2627_v14, %v2651_v38 }
 0x6d7   :  { %2191 = vtanh.f32 %v521_v61  ;;  %v1997_v1 = vpop.f32.mrb[15].mxu1 }
 0x6e1   :  { %v2192_v2 = vpop.eup %2191 }
 0x6e2   :  { %527 = vrot.lane.b32.xlu0 %v2192_v2, %s2417_s29  ;;  %v523_v4 = vmul.f32 0.5, %v2192_v2 }
 0x6e4   :  { %v524_v6 = vadd.f32 0.5, %v523_v4 }
 0x6e6   :  { %v525_v10 = vmul.f32 %v524_v6, %v458_v53 }
 0x754   :  { %v528_v7 = vpop.permute.xlu0 %527 }
 0x755   :  { %v530_v8 = vmul.f32 %v528_v7, %v524_v6 }
 0x757   :  { %532 = vrot.lane.b32.xlu1 %v530_v8, %s2426_s14 }
 0x7c9   :  { %v533_v11 = vpop.permute.xlu1 %532 }
 0x7ca   :  { %v535_v12 = vadd.f32 %v533_v11, %v525_v10 }
 0x7cc   :  { %2193 = vtanh.f32 %v535_v12 }
 0x7d6   :  { %v2194_v13 = vpop.eup %2193 }
 0x7d7   :  { %538 = vrot.lane.b32.xlu0 %v2194_v13, %s2417_s29 }
 0x849   :  { %v539_v15 = vpop.permute.xlu0 %538 }
 0x84a   :  { %v541_v16 = vmul.f32 %v539_v15, %v524_v6 }
 0x84c   :  { %v2680_v17 = vpack.c.bf16 %v541_v16, %v541_v16 }
 0x84e   :  { %553 = vrot.lane.b32.xlu1 %v2680_v17, %s2426_s14 }
 0x8c0   :  { %v554_v19 = vpop.permute.xlu1 %553 }
 0x8c1   :  { %2003 = vmatmul.mubr.msk.bf16.vlgmr.msra.gmra.mrb[4].mxu0 %vm323_vm2, %v554_v19 }
 0x8c2   :  { %2015 = vmatpush3.bf16.msra.mxu0 %v2602_v3  ;;  %2018 = vmatprep.mubr.msk.bf16.mxu0 %vm2424_vm0, %v2423_v0 }
 0x8c3   :  { %2016 = vmatprep.subr.bf16.mxu0 %v2423_v0 }
 0x8c6   :  { %2017 = vmatpush3.bf16.msra.mxu0 %v2605_v5 }
 0x8c7   :  { %2030 = vmatprep.subr.bf16.mxu0 %v2423_v0 }
 0x994   :  { %v592_v21 = vpop.f32.mrb[4].mxu0 }
 0x995   :  { %v598_v22 = vadd.f32 %v592_v21, %v283_v20  ;;  %v2004_v23 = vpop.f32.mrb[5].mxu0  ;;  %v296_v21 = vadd.f32 %v2645_v35, %v2627_v14 }
 0x996   :  { %v595_v24 = vpop.f32.mrb[6].mxu0 }
 0x997   :  { %2195 = vtanh.f32 %v598_v22  ;;  %v2005_v25 = vpop.f32.mrb[7].mxu0 }
 0x9a1   :  { %v2196_v26 = vpop.eup %2195 }
 0x9a2   :  { %604 = vrot.lane.b32.xlu0 %v2196_v26, %s2417_s29  ;;  %v600_v27 = vmul.f32 0.5, %v2196_v26 }
 0x9a4   :  { %v601_v28 = vadd.f32 0.5, %v600_v27 }
 0x9a6   :  { %v602_v31 = vmul.f32 %v601_v28, %v535_v12 }
 0xa14   :  { %v605_v29 = vpop.permute.xlu0 %604 }
 0xa15   :  { %v607_v30 = vmul.f32 %v605_v29, %v601_v28 }
 0xa17   :  { %609 = vrot.lane.b32.xlu1 %v607_v30, %s2426_s14 }
 0xa89   :  { %v610_v32 = vpop.permute.xlu1 %609 }
 0xa8a   :  { %v612_v33 = vadd.f32 %v610_v32, %v602_v31 }
 0xa8c   :  { %2197 = vtanh.f32 %v612_v33 }
 0xa96   :  { %v2198_v18 = vpop.eup %2197 }
 0xa97   :  { %615 = vrot.lane.b32.xlu0 %v2198_v18, %s2417_s29 }
 0xb09   :  { %v616_v39 = vpop.permute.xlu0 %615 }
 0xb0a   :  { %v618_v40 = vmul.f32 %v616_v39, %v601_v28 }
 0xb0c   :  { %v2696_v41 = vpack.c.bf16 %v618_v40, %v618_v40  ;;  %v2165_v40 = vld [vmem:[#allocation10] sm:$0xff]  }
 0xb0e   :  { %630 = vrot.lane.b32.xlu1 %v2696_v41, %s2426_s14 }
 0xb80   :  { %v631_v42 = vpop.permute.xlu1 %630 }
 0xb81   :  { %2011 = vmatmul.mubr.msk.bf16.vlgmr.msra.gmra.mrb[16].mxu1 %vm323_vm2, %v631_v42  ;;  %v2166_v42 = vld [vmem:[#allocation10 + $0x8] sm:$0xff]  }
 0xb82   :  { %2023 = vmatpush3.bf16.msra.mxu1 %v2602_v3  ;;  %2026 = vmatprep.mubr.msk.bf16.mxu1 %vm2424_vm0, %v2423_v0 }
 0xb83   :  { %2024 = vmatprep.subr.bf16.mxu1 %v2423_v0 }
 0xb86   :  { %2025 = vmatpush3.bf16.msra.mxu1 %v2605_v5 }
 0xb87   :  { %2038 = vmatprep.subr.bf16.mxu1 %v2165_v40 }
 0xc54   :  { %v669_v44 = vpop.f32.mrb[16].mxu1 }
 0xc55   :  { %v675_v45 = vadd.f32 %v669_v44, %v288_v43  ;;  %v2012_v46 = vpop.f32.mrb[17].mxu1 }
 0xc56   :  { %v672_v47 = vpop.f32.mrb[18].mxu1 }
 0xc57   :  { %2199 = vtanh.f32 %v675_v45  ;;  %v2013_v48 = vpop.f32.mrb[19].mxu1 }
 0xc58   :  { %v2769_v48 = vld [vmem:[%s2944_s5 + $0x8] sm:$0xff]  }
 0xc61   :  { %v2200_v49 = vpop.eup %2199 }
 0xc62   :  { %681 = vrot.lane.b32.xlu0 %v2200_v49, %s2417_s29  ;;  %v677_v50 = vmul.f32 0.5, %v2200_v49 }
 0xc64   :  { %v678_v51 = vadd.f32 0.5, %v677_v50 }
 0xc66   :  { %v679_v54 = vmul.f32 %v678_v51, %v612_v33 }
 0xcd4   :  { %v682_v52 = vpop.permute.xlu0 %681 }
 0xcd5   :  { %v684_v53 = vmul.f32 %v682_v52, %v678_v51 }
 0xcd7   :  { %686 = vrot.lane.b32.xlu1 %v684_v53, %s2426_s14 }
 0xd49   :  { %v687_v55 = vpop.permute.xlu1 %686 }
 0xd4a   :  { %v689_v56 = vadd.f32 %v687_v55, %v679_v54 }
 0xd4c   :  { %2201 = vtanh.f32 %v689_v56 }
 0xd56   :  { %v2202_v36 = vpop.eup %2201 }
 0xd57   :  { %692 = vrot.lane.b32.xlu0 %v2202_v36, %s2417_s29 }
 0xdc9   :  { %v693_v58 = vpop.permute.xlu0 %692 }
 0xdca   :  { %v695_v59 = vmul.f32 %v693_v58, %v678_v51 }
 0xdcc   :  { %v2711_v60 = vpack.c.bf16 %v695_v59, %v695_v59  ;;  %v2796_v59 = vld [vmem:[%s2945_s6] ss:$0 sm:$0xff] }
 0xdce   :  { %707 = vrot.lane.b32.xlu1 %v2711_v60, %s2426_s14 }
 0xe40   :  { %v708_v61 = vpop.permute.xlu1 %707 }
 0xe41   :  { %2019 = vmatmul.mubr.msk.bf16.vlgmr.msra.gmra.mrb[8].mxu0 %vm323_vm2, %v708_v61 }
 0xe42   :  { %2031 = vmatpush3.bf16.msra.mxu0 %v2602_v3  ;;  %2034 = vmatprep.mubr.msk.bf16.mxu0 %vm2424_vm0, %v2423_v0 }
 0xe43   :  { %2032 = vmatprep.subr.bf16.mxu0 %v2423_v0 }
 0xe46   :  { %2033 = vmatpush3.bf16.msra.mxu0 %v2605_v5 }
 0xe47   :  { %2050 = vmatprep.subr.bf16.mxu0 %v2423_v0 }
 0xf14   :  { %v746_v63 = vpop.f32.mrb[8].mxu0 }
 0xf15   :  { %v752_v1 = vadd.f32 %v746_v63, %v291_v62  ;;  %v2020_v2 = vpop.f32.mrb[9].mxu0 }
 0xf16   :  { %v749_v4 = vpop.f32.mrb[10].mxu0 }
 0xf17   :  { %2203 = vtanh.f32 %v752_v1  ;;  %v2021_v6 = vpop.f32.mrb[11].mxu0 }
 0xf21   :  { %v2204_v7 = vpop.eup %2203 }
 0xf22   :  { %758 = vrot.lane.b32.xlu0 %v2204_v7, %s2417_s29  ;;  %v754_v3 = vmul.f32 0.5, %v2204_v7 }
 0xf24   :  { %v755_v8 = vadd.f32 0.5, %v754_v3 }
 0xf26   :  { %v756_v5 = vmul.f32 %v755_v8, %v689_v56 }
 0xf94   :  { %v759_v10 = vpop.permute.xlu0 %758 }
 0xf95   :  { %v761_v11 = vmul.f32 %v759_v10, %v755_v8 }
 0xf97   :  { %763 = vrot.lane.b32.xlu1 %v761_v11, %s2426_s14 }
0x1009   :  { %v764_v12 = vpop.permute.xlu1 %763 }
0x100a   :  { %v766_v13 = vadd.f32 %v764_v12, %v756_v5 }
0x100c   :  { %2205 = vtanh.f32 %v766_v13 }
0x1016   :  { %v2206_v38 = vpop.eup %2205 }
0x1017   :  { %769 = vrot.lane.b32.xlu0 %v2206_v38, %s2417_s29 }
0x1089   :  { %v770_v15 = vpop.permute.xlu0 %769 }
0x108a   :  { %v772_v16 = vmul.f32 %v770_v15, %v755_v8 }
0x108c   :  { %v2727_v19 = vpack.c.bf16 %v772_v16, %v772_v16 }
0x108e   :  { %784 = vrot.lane.b32.xlu1 %v2727_v19, %s2426_s14 }
0x1100   :  { %v785_v20 = vpop.permute.xlu1 %784 }
0x1101   :  { %2027 = vmatmul.mubr.msk.bf16.vlgmr.msra.gmra.mrb[20].mxu1 %vm323_vm2, %v785_v20 }
0x1102   :  { %2039 = vmatpush3.bf16.msra.mxu1 %v2165_v40 }
0x1103   :  { %2040 = vmatprep.subr.bf16.mxu1 %v2166_v42 }
0x1106   :  { %2041 = vmatpush3.bf16.msra.mxu1 %v2166_v42 }
0x1107   :  { %2066 = vmatprep.subr.bf16.mxu1 %v2423_v0 }
0x11d4   :  { %v823_v22 = vpop.f32.mrb[20].mxu1 }
0x11d5   :  { %v829_v23 = vadd.f32 %v823_v22, %v296_v21  ;;  %v2028_v24 = vpop.f32.mrb[21].mxu1 }
0x11d6   :  { %v826_v25 = vpop.f32.mrb[22].mxu1 }
0x11d7   :  { %2207 = vtanh.f32 %v829_v23  ;;  %v2029_v26 = vpop.f32.mrb[23].mxu1 }
0x11e1   :  { %v2208_v27 = vpop.eup %2207 }
0x11e2   :  { %835 = vrot.lane.b32.xlu0 %v2208_v27, %s2417_s29  ;;  %v831_v28 = vmul.f32 0.5, %v2208_v27 }
0x11e4   :  { %v832_v29 = vadd.f32 0.5, %v831_v28 }
0x11e6   :  { %v833_v35 = vmul.f32 %v832_v29, %v766_v13 }
0x1254   :  { %v836_v30 = vpop.permute.xlu0 %835 }
0x1255   :  { %v838_v31 = vmul.f32 %v836_v30, %v832_v29 }
0x1257   :  { %840 = vrot.lane.b32.xlu1 %v838_v31, %s2426_s14 }
0x125b   :  { %392 = vrot.lane.b32.xlu1 %v2641_v34, %s2426_s14 }
0x125f   :  { %546 = vrot.lane.b32.xlu1 %v2680_v17, %s2426_s14 }
0x12c9   :  { %v841_v32 = vpop.permute.xlu1 %840 }
0x12ca   :  { %v2740_v33 = vadd.f32 %v841_v32, %v833_v35 }
0x12cc   :  { %2209 = vtanh.f32 %v2740_v33 }
0x12cd   :  { %v393_v18 = vpop.permute.xlu1 %392 }
0x12ce   :  { %396 = vst.msk [vmem:[#allocation3] sm:$0xf] %vm395_vm3, %v393_v18 }
0x12d1   :  { %v547_v39 = vpop.permute.xlu1 %546 }
0x12d2   :  { %550 = vst.msk [vmem:[#allocation3 + $0x8] sm:$0xf] %vm395_vm3, %v547_v39 }
0x12d6   :  { %v2210_v34 = vpop.eup %2209 }
0x12d7   :  { %846 = vrot.lane.b32.xlu0 %v2210_v34, %s2417_s29 }
0x12db   :  { %469 = vrot.lane.b32.xlu0 %v2664_v57, %s2426_s14 }
0x12df   :  { %623 = vrot.lane.b32.xlu0 %v2696_v41, %s2426_s14  ;;  %v2761_v41 = vld [vmem:[%s2944_s5] sm:$0xff]  }
0x1349   :  { %v847_v17 = vpop.permute.xlu0 %846 }
0x134a   :  { %v849_v43 = vmul.f32 %v847_v17, %v832_v29 }
0x134c   :  { %v2751_v44 = vpack.c.bf16 %v849_v43, %v849_v43 }
0x134d   :  { %v470_v45 = vpop.permute.xlu0 %469 }
0x134e   :  { %473 = vst.msk [vmem:[#allocation3 + $0x4] sm:$0xf] %vm395_vm3, %v470_v45  ;;  %861 = vrot.lane.b32.xlu1 %v2751_v44, %s2426_s14 }
0x1351   :  { %v624_v46 = vpop.permute.xlu0 %623 }
0x1352   :  { %627 = vst.msk [vmem:[#allocation3 + $0xc] sm:$0xf] %vm395_vm3, %v624_v46 }
0x1355   :  { %v2167_v47 = vld [vmem:[#allocation3] sm:$0xff]  }
0x1356   :  { %2042 = vmatprep.mubr.msk.bf16.mxu1 %vm323_vm2, %v2167_v47 }
0x1359   :  { %v2168_v57 = vld [vmem:[#allocation3 + $0x8] sm:$0xff]  }
0x135a   :  { %2043 = vmatmul.mubr.msk.bf16.vlgmr.msra.gmra.mrb[24].mxu1 %vm323_vm2, %v2168_v57 }
0x135b   :  { %2067 = vmatpush3.bf16.msra.mxu1 %v2761_v41 }
0x135c   :  { %2068 = vmatprep.subr.bf16.mxu1 %v2423_v0 }
0x135f   :  { %2069 = vmatpush3.bf16.msra.mxu1 %v2769_v48 }
0x1360   :  { %2082 = vmatprep.subr.bf16.mxu1 %v2423_v0 }
0x13c0   :  { %v862_v49 = vpop.permute.xlu1 %861 }
0x13c1   :  { %2035 = vmatmul.mubr.msk.bf16.vlgmr.msra.gmra.mrb[12].mxu0 %vm323_vm2, %v862_v49 }
0x13c2   :  { %2051 = vmatpush3.bf16.msra.mxu0 %v2761_v41  ;;  %2054 = vmatprep.mubr.msk.bf16.mxu0 %vm2424_vm0, %v2423_v0 }
0x13c3   :  { %2052 = vmatprep.subr.bf16.mxu0 %v2423_v0 }
0x13c6   :  { %2053 = vmatpush3.bf16.msra.mxu0 %v2769_v48 }
0x13c7   :  { %2058 = vmatprep.subr.bf16.mxu0 %v2423_v0 }
0x13c9   :  { %2055 = vmatmul.mubr.bf16.vlgmr.msra.gmra.mrb[16].mxu0 %v2425_v9  ;;  %v299_v9 = vadd.f32 %v2649_v37, %v2627_v14 }
0x13ca   :  { %2059 = vmatpush3.bf16.msra.mxu0 %v2761_v41  ;;  %2062 = vmatprep.mubr.msk.bf16.mxu0 %vm2424_vm0, %v2423_v0 }
0x13cb   :  { %2060 = vmatprep.subr.bf16.mxu0 %v2423_v0 }
0x13ce   :  { %2061 = vmatpush3.bf16.msra.mxu0 %v2769_v48 }
0x13cf   :  { %2074 = vmatprep.subr.bf16.mxu0 %v2423_v0 }
0x142d   :  { %v2787_v50 = vpop.f32.mrb[24].mxu1 }
0x142e   :  { %v1028_v51 = vpop.f32.mrb[25].mxu1 }
0x142f   :  { %v2789_v52 = vpop.f32.mrb[26].mxu1  ;;  %v1029_v61 = vadd.f32 %v2796_v59, %v1028_v51 }
0x1430   :  { %v1031_v53 = vpop.f32.mrb[27].mxu1 }
0x1431   :  { %v1032_v31 = vadd.f32 %v2796_v59, %v1031_v53 }
0x1494   :  { %v900_v54 = vpop.f32.mrb[12].mxu0 }
0x1495   :  { %v906_v55 = vadd.f32 %v900_v54, %v299_v9  ;;  %v2036_v56 = vpop.f32.mrb[13].mxu0 }
0x1496   :  { %v903_v36 = vpop.f32.mrb[14].mxu0 }
0x1497   :  { %v2037_v58 = vpop.f32.mrb[15].mxu0 }
0x149c   :  { %v1114_v62 = vpop.f32.mrb[16].mxu0 }
0x149d   :  { %v1120_v63 = vadd.f32 %v1114_v62, %v1029_v61  ;;  %v2056_v1 = vpop.f32.mrb[17].mxu0 }
0x149e   :  { %v1117_v2 = vpop.f32.mrb[18].mxu0 }
0x149f   :  { %2211 = vtanh.f32 %v1120_v63  ;;  %v2057_v4 = vpop.f32.mrb[19].mxu0  ;;  %v1037_v63 = vadd.f32 %v2787_v50, %v2796_v59 }
0x14a9   :  { %v2212_v6 = vpop.eup %2211 }
0x14aa   :  { %1126 = vrot.lane.b32.xlu0 %v2212_v6, %s2417_s29  ;;  %v1122_v14 = vmul.f32 0.5, %v2212_v6 }
0x14ac   :  { %v1123_v37 = vadd.f32 0.5, %v1122_v14 }
0x14ae   :  { %v1124_v8 = vmul.f32 0.0, %v1123_v37 }
0x151c   :  { %v1127_v7 = vpop.permute.xlu0 %1126 }
0x151d   :  { %v1129_v3 = vmul.f32 %v1127_v7, %v1123_v37 }
0x151f   :  { %1131 = vrot.lane.b32.xlu1 %v1129_v3, %s2426_s14 }
0x1591   :  { %v1132_v10 = vpop.permute.xlu1 %1131 }
0x1592   :  { %v1134_v11 = vadd.f32 %v1132_v10, %v1124_v8 }
0x1594   :  { %2213 = vtanh.f32 %v1134_v11 }
0x1595   :  { %2215 = vtanh.f32 %v906_v55 }
0x159e   :  { %v2214_v5 = vpop.eup %2213 }
0x159f   :  { %1137 = vrot.lane.b32.xlu0 %v2214_v5, %s2417_s29  ;;  %v2216_v12 = vpop.eup %2215 }
0x15a0   :  { %v908_v13 = vmul.f32 0.5, %v2216_v12 }
0x15a2   :  { %v909_v20 = vadd.f32 0.5, %v908_v13 }
0x15a3   :  { %912 = vrot.lane.b32.xlu0 %v2216_v12, %s2417_s29 }
0x15a4   :  { %v910_v24 = vmul.f32 %v909_v20, %v2740_v33 }
0x1611   :  { %v1138_v38 = vpop.permute.xlu0 %1137 }
0x1612   :  { %v1140_v15 = vmul.f32 %v1138_v38, %v1123_v37 }
0x1614   :  { %v1142_v16 = vpack.c.bf16 %v1140_v15, %v1140_v15 }
0x1615   :  { %v913_v21 = vpop.permute.xlu0 %912 }
0x1616   :  { %v915_v22 = vmul.f32 %v913_v21, %v909_v20  ;;  %1144 = vrot.lane.b32.xlu1 %v1142_v16, %s2426_s14 }
0x1618   :  { %917 = vrot.lane.b32.xlu0 %v915_v22, %s2426_s14 }
0x1688   :  { %v1145_v23 = vpop.permute.xlu1 %1144 }
0x1689   :  { %2063 = vmatmul.mubr.msk.bf16.vlgmr.msra.gmra.mrb[20].mxu0 %vm323_vm2, %v1145_v23 }
0x168a   :  { %v918_v25 = vpop.permute.xlu0 %917  ;;  %2075 = vmatpush3.bf16.msra.mxu0 %v2761_v41  ;;  %2078 = vmatprep.mubr.msk.bf16.mxu0 %vm2424_vm0, %v2423_v0 }
0x168b   :  { %v920_v26 = vadd.f32 %v918_v25, %v910_v24  ;;  %2076 = vmatprep.subr.bf16.mxu0 %v2423_v0 }
0x168d   :  { %2217 = vtanh.f32 %v920_v26 }
0x168e   :  { %2077 = vmatpush3.bf16.msra.mxu0 %v2769_v48 }
0x168f   :  { %2090 = vmatprep.subr.bf16.mxu0 %v2423_v0 }
0x1697   :  { %v2218_v27 = vpop.eup %2217 }
0x1698   :  { %923 = vrot.lane.b32.xlu0 %v2218_v27, %s2417_s29 }
0x169c   :  { %700 = vrot.lane.b32.xlu0 %v2711_v60, %s2426_s14 }
0x16a0   :  { %854 = vrot.lane.b32.xlu0 %v2751_v44, %s2426_s14 }
0x170a   :  { %v924_v28 = vpop.permute.xlu0 %923 }
0x170b   :  { %v926_v47 = vmul.f32 %v924_v28, %v909_v20  ;;  %v1040_v20 = vadd.f32 %v2789_v52, %v2796_v59 }
0x170d   :  { %v1883_v57 = vpack.c.bf16 %v926_v47, %v926_v47 }
0x170e   :  { %v701_v29 = vpop.permute.xlu0 %700 }
0x170f   :  { %704 = vst.msk [vmem:[#allocation3 + $0x10] sm:$0xf] %vm395_vm3, %v701_v29 }
0x1712   :  { %v855_v30 = vpop.permute.xlu0 %854 }
0x1713   :  { %858 = vst.msk [vmem:[#allocation3 + $0x18] sm:$0xf] %vm395_vm3, %v855_v30 }
0x175c   :  { %v1183_v35 = vpop.f32.mrb[20].mxu0 }
0x175d   :  { %v1189_v32 = vadd.f32 %v1183_v35, %v1032_v31  ;;  %v2064_v33 = vpop.f32.mrb[21].mxu0 }
0x175e   :  { %v1186_v18 = vpop.f32.mrb[22].mxu0 }
0x175f   :  { %2219 = vtanh.f32 %v1189_v32  ;;  %v2065_v39 = vpop.f32.mrb[23].mxu0 }
0x1769   :  { %v2220_v40 = vpop.eup %2219 }
0x176a   :  { %1195 = vrot.lane.b32.xlu1 %v2220_v40, %s2417_s29  ;;  %v1191_v60 = vmul.f32 0.5, %v2220_v40 }
0x176c   :  { %v1192_v42 = vadd.f32 0.5, %v1191_v60 }
0x176e   :  { %v1193_v43 = vmul.f32 %v1192_v42, %v1134_v11 }
0x17dc   :  { %v1196_v34 = vpop.permute.xlu1 %1195 }
0x17dd   :  { %v1198_v17 = vmul.f32 %v1196_v34, %v1192_v42 }
0x17df   :  { %1200 = vrot.lane.b32.xlu1 %v1198_v17, %s2426_s14 }
0x1851   :  { %v1201_v44 = vpop.permute.xlu1 %1200 }
0x1852   :  { %v1203_v45 = vadd.f32 %v1201_v44, %v1193_v43 }
0x1854   :  { %2221 = vtanh.f32 %v1203_v45 }
0x185e   :  { %v2222_v46 = vpop.eup %2221 }
0x185f   :  { %1206 = vrot.lane.b32.xlu1 %v2222_v46, %s2417_s29 }
0x1863   :  { %777 = vrot.lane.b32.xlu1 %v2727_v19, %s2426_s14 }
0x1867   :  { %931 = vrot.lane.b32.xlu1 %v1883_v57, %s2426_s14 }
0x18d1   :  { %v1207_v49 = vpop.permute.xlu1 %1206 }
0x18d2   :  { %v1209_v51 = vmul.f32 %v1207_v49, %v1192_v42 }
0x18d4   :  { %v1211_v53 = vpack.c.bf16 %v1209_v51, %v1209_v51 }
0x18d5   :  { %v778_v9 = vpop.permute.xlu1 %777 }
0x18d6   :  { %781 = vst.msk [vmem:[#allocation3 + $0x14] sm:$0xf] %vm395_vm3, %v778_v9  ;;  %1213 = vrot.lane.b32.xlu0 %v1211_v53, %s2426_s14 }
0x18d9   :  { %v932_v54 = vpop.permute.xlu1 %931 }
0x18da   :  { %935 = vst.msk [vmem:[#allocation3 + $0x1c] sm:$0xf] %vm395_vm3, %v932_v54 }
0x18dd   :  { %v2171_v55 = vld [vmem:[#allocation3 + $0x10] sm:$0xff]  }
0x18de   :  { %2046 = vmatprep.mubr.msk.bf16.mxu1 %vm323_vm2, %v2171_v55 }
0x18e1   :  { %v2172_v56 = vld [vmem:[#allocation3 + $0x18] sm:$0xff]  }
0x18e2   :  { %2047 = vmatmul.mubr.msk.bf16.gmra.mrb[28].mxu1 %vm323_vm2, %v2172_v56 }
0x18e3   :  { %2070 = vmatprep.mubr.msk.bf16.mxu1 %vm2424_vm0, %v2423_v0 }
0x1948   :  { %v1214_v19 = vpop.permute.xlu0 %1213 }
0x1949   :  { %2071 = vmatmul.mubr.msk.bf16.vlgmr.msra.gmra.mrb[32].mxu1 %vm323_vm2, %v1214_v19 }
0x194a   :  { %2083 = vmatpush3.bf16.msra.mxu1 %v2761_v41  ;;  %2086 = vmatprep.mubr.msk.bf16.mxu1 %vm2424_vm0, %v2423_v0 }
0x194b   :  { %2084 = vmatprep.subr.bf16.mxu1 %v2423_v0 }
0x194e   :  { %2085 = vmatpush3.bf16.msra.mxu1 %v2769_v48 }
0x194f   :  { %2098 = vmatprep.subr.bf16.mxu1 %v2423_v0 }
0x19b5   :  { %v2841_v36 = vpop.f32.mrb[28].mxu1 }
0x19b6   :  { %v2843_v58 = vpop.f32.mrb[29].mxu1 }
0x19b7   :  { %v2845_v61 = vpop.f32.mrb[30].mxu1  ;;  %v1045_v60 = vadd.f32 %v2796_v59, %v2843_v58 }
0x19b8   :  { %v2847_v62 = vpop.f32.mrb[31].mxu1 }
0x1a1c   :  { %v1252_v1 = vpop.f32.mrb[32].mxu1 }
0x1a1d   :  { %v1258_v2 = vadd.f32 %v1252_v1, %v1037_v63  ;;  %v2072_v4 = vpop.f32.mrb[33].mxu1  ;;  %v1048_v63 = vadd.f32 %v2796_v59, %v2847_v62 }
0x1a1e   :  { %v1255_v6 = vpop.f32.mrb[34].mxu1 }
0x1a1f   :  { %2223 = vtanh.f32 %v1258_v2  ;;  %v2073_v14 = vpop.f32.mrb[35].mxu1 }
0x1a29   :  { %v2224_v37 = vpop.eup %2223 }
0x1a2a   :  { %1264 = vrot.lane.b32.xlu1 %v2224_v37, %s2417_s29  ;;  %v1260_v7 = vmul.f32 0.5, %v2224_v37 }
0x1a2c   :  { %v1261_v3 = vadd.f32 0.5, %v1260_v7 }
0x1a2e   :  { %v1262_v11 = vmul.f32 %v1261_v3, %v1203_v45 }
0x1a9c   :  { %v1265_v8 = vpop.permute.xlu1 %1264 }
0x1a9d   :  { %v1267_v10 = vmul.f32 %v1265_v8, %v1261_v3 }
0x1a9f   :  { %1269 = vrot.lane.b32.xlu0 %v1267_v10, %s2426_s14 }
0x1b11   :  { %v1270_v5 = vpop.permute.xlu0 %1269 }
0x1b12   :  { %v1272_v12 = vadd.f32 %v1270_v5, %v1262_v11 }
0x1b14   :  { %2225 = vtanh.f32 %v1272_v12 }
0x1b1e   :  { %v2226_v50 = vpop.eup %2225 }
0x1b1f   :  { %1275 = vrot.lane.b32.xlu1 %v2226_v50, %s2417_s29 }
0x1b91   :  { %v1276_v13 = vpop.permute.xlu1 %1275 }
0x1b92   :  { %v1278_v38 = vmul.f32 %v1276_v13, %v1261_v3 }
0x1b94   :  { %v1280_v15 = vpack.c.bf16 %v1278_v38, %v1278_v38  ;;  %v1053_v38 = vadd.f32 %v2841_v36, %v2796_v59 }
0x1b96   :  { %1282 = vrot.lane.b32.xlu0 %v1280_v15, %s2426_s14 }
0x1c08   :  { %v1283_v16 = vpop.permute.xlu0 %1282 }
0x1c09   :  { %2079 = vmatmul.mubr.msk.bf16.vlgmr.msra.gmra.mrb[24].mxu0 %vm323_vm2, %v1283_v16 }
0x1c0a   :  { %2091 = vmatpush3.bf16.msra.mxu0 %v2761_v41  ;;  %2094 = vmatprep.mubr.msk.bf16.mxu0 %vm2424_vm0, %v2423_v0 }
0x1c0b   :  { %2092 = vmatprep.subr.bf16.mxu0 %v2423_v0 }
0x1c0e   :  { %2093 = vmatpush3.bf16.msra.mxu0 %v2769_v48 }
0x1c0f   :  { %2106 = vmatprep.subr.bf16.mxu0 %v2423_v0 }
0x1cdc   :  { %v1321_v21 = vpop.f32.mrb[24].mxu0 }
0x1cdd   :  { %v1327_v22 = vadd.f32 %v1321_v21, %v1040_v20  ;;  %v2080_v23 = vpop.f32.mrb[25].mxu0 }
0x1cde   :  { %v1324_v24 = vpop.f32.mrb[26].mxu0 }
0x1cdf   :  { %2227 = vtanh.f32 %v1327_v22  ;;  %v2081_v25 = vpop.f32.mrb[27].mxu0 }
0x1ce9   :  { %v2228_v26 = vpop.eup %2227 }
0x1cea   :  { %1333 = vrot.lane.b32.xlu1 %v2228_v26, %s2417_s29  ;;  %v1329_v27 = vmul.f32 0.5, %v2228_v26 }
0x1cec   :  { %v1330_v28 = vadd.f32 0.5, %v1329_v27 }
0x1cee   :  { %v1331_v31 = vmul.f32 %v1330_v28, %v1272_v12 }
0x1d5c   :  { %v1334_v29 = vpop.permute.xlu1 %1333 }
0x1d5d   :  { %v1336_v30 = vmul.f32 %v1334_v29, %v1330_v28 }
0x1d5f   :  { %1338 = vrot.lane.b32.xlu0 %v1336_v30, %s2426_s14 }
0x1dd1   :  { %v1339_v35 = vpop.permute.xlu0 %1338 }
0x1dd2   :  { %v1341_v32 = vadd.f32 %v1339_v35, %v1331_v31 }
0x1dd4   :  { %2229 = vtanh.f32 %v1341_v32 }
0x1dde   :  { %v2230_v52 = vpop.eup %2229 }
0x1ddf   :  { %1344 = vrot.lane.b32.xlu1 %v2230_v52, %s2417_s29 }
0x1e51   :  { %v1345_v33 = vpop.permute.xlu1 %1344 }
0x1e52   :  { %v1347_v18 = vmul.f32 %v1345_v33, %v1330_v28  ;;  %v1056_v33 = vadd.f32 %v2845_v61, %v2796_v59  ;;  %v2173_v59 = vld [vmem:[#allocation12] sm:$0xff]   ;;  %v2174_v61 = vld [vmem:[#allocation12 + $0x8] sm:$0xff]  }
0x1e54   :  { %v1349_v39 = vpack.c.bf16 %v1347_v18, %v1347_v18 }
0x1e56   :  { %1351 = vrot.lane.b32.xlu0 %v1349_v39, %s2426_s14 }
0x1ec8   :  { %v1352_v40 = vpop.permute.xlu0 %1351 }
0x1ec9   :  { %2087 = vmatmul.mubr.msk.bf16.vlgmr.msra.gmra.mrb[36].mxu1 %vm323_vm2, %v1352_v40 }
0x1eca   :  { %2099 = vmatpush3.bf16.msra.mxu1 %v2761_v41  ;;  %2102 = vmatprep.mubr.msk.bf16.mxu1 %vm2424_vm0, %v2423_v0 }
0x1ecb   :  { %2100 = vmatprep.subr.bf16.mxu1 %v2423_v0 }
0x1ece   :  { %2101 = vmatpush3.bf16.msra.mxu1 %v2769_v48 }
0x1ecf   :  { %2114 = vmatprep.subr.bf16.mxu1 %v2423_v0 }
0x1f9c   :  { %v1390_v42 = vpop.f32.mrb[36].mxu1 }
0x1f9d   :  { %v1396_v34 = vadd.f32 %v1390_v42, %v1045_v60  ;;  %v2088_v17 = vpop.f32.mrb[37].mxu1 }
0x1f9e   :  { %v1393_v43 = vpop.f32.mrb[38].mxu1 }
0x1f9f   :  { %2231 = vtanh.f32 %v1396_v34  ;;  %v2089_v44 = vpop.f32.mrb[39].mxu1 }
0x1fa9   :  { %v2232_v45 = vpop.eup %2231 }
0x1faa   :  { %1402 = vrot.lane.b32.xlu1 %v2232_v45, %s2417_s29  ;;  %v1398_v46 = vmul.f32 0.5, %v2232_v45 }
0x1fac   :  { %v1399_v47 = vadd.f32 0.5, %v1398_v46 }
0x1fae   :  { %v1400_v51 = vmul.f32 %v1399_v47, %v1341_v32 }
0x201c   :  { %v1403_v57 = vpop.permute.xlu1 %1402 }
0x201d   :  { %v1405_v49 = vmul.f32 %v1403_v57, %v1399_v47 }
0x201f   :  { %1407 = vrot.lane.b32.xlu0 %v1405_v49, %s2426_s14 }
0x2091   :  { %v1408_v53 = vpop.permute.xlu0 %1407 }
0x2092   :  { %v1410_v9 = vadd.f32 %v1408_v53, %v1400_v51  ;;  %v2175_v51 = vld [vmem:[#allocation13] sm:$0xff]   ;;  %v2176_v53 = vld [vmem:[#allocation13 + $0x8] sm:$0xff]  }
0x2094   :  { %2233 = vtanh.f32 %v1410_v9 }
0x209e   :  { %v2234_v54 = vpop.eup %2233 }
0x209f   :  { %1413 = vrot.lane.b32.xlu1 %v2234_v54, %s2417_s29 }
0x2111   :  { %v1414_v55 = vpop.permute.xlu1 %1413 }
0x2112   :  { %v1416_v56 = vmul.f32 %v1414_v55, %v1399_v47 }
0x2114   :  { %v1418_v19 = vpack.c.bf16 %v1416_v56, %v1416_v56  ;;  %v2178_v56 = vld [vmem:[#allocation13 + $0x18] sm:$0xff]  }
0x2116   :  { %1420 = vrot.lane.b32.xlu0 %v1418_v19, %s2426_s14 }
0x2188   :  { %v1421_v58 = vpop.permute.xlu0 %1420 }
0x2189   :  { %2095 = vmatmul.mubr.msk.bf16.vlgmr.msra.gmra.mrb[28].mxu0 %vm323_vm2, %v1421_v58  ;;  %v2179_v58 = vld [vmem:[#allocation13 + $0x20] sm:$0xff]  }
0x218a   :  { %2107 = vmatpush3.bf16.msra.mxu0 %v2761_v41  ;;  %2110 = vmatprep.mubr.msk.bf16.mxu0 %vm2424_vm0, %v2423_v0 }
0x218b   :  { %2108 = vmatprep.subr.bf16.mxu0 %v2423_v0 }
0x218e   :  { %2109 = vmatpush3.bf16.msra.mxu0 %v2769_v48 }
0x218f   :  { %2122 = vmatprep.subr.bf16.mxu0 %v2423_v0 }
0x225c   :  { %v1459_v1 = vpop.f32.mrb[28].mxu0 }
0x225d   :  { %v1465_v2 = vadd.f32 %v1459_v1, %v1048_v63  ;;  %v2096_v4 = vpop.f32.mrb[29].mxu0  ;;  %v2180_v63 = vld [vmem:[#allocation13 + $0x28] sm:$0xff]  }
0x225e   :  { %v1462_v6 = vpop.f32.mrb[30].mxu0  ;;  %v2182_v4 = vld [vmem:[#allocation13 + $0x38] sm:$0xff]  }
0x225f   :  { %2235 = vtanh.f32 %v1465_v2  ;;  %v2097_v14 = vpop.f32.mrb[31].mxu0  ;;  %v2181_v2 = vld [vmem:[#allocation13 + $0x30] sm:$0xff]  }
0x2260   :  { %v1863_v6 = vld [vmem:[%s2947_s8] ss:$0 sm:$0xff]  ;;  %s2427_s8 = smov [#allocation15]  }
0x2261   :  { %s1801_s21 = sshll.u32 %s2427_s8, 4  ;;  %s1802_s21 = int_to_ptr.vmem [resolvable:$true] %s1801_s21 }
0x2262   :  { %p2388_p7 = scmp.lt.s32.totalorder %s1802_s21, %s1802_s21 }
0x2269   :  { %v2236_v37 = vpop.eup %2235 }
0x226a   :  { %1471 = vrot.lane.b32.xlu1 %v2236_v37, %s2417_s29  ;;  %v1467_v41 = vmul.f32 0.5, %v2236_v37 }
0x226c   :  { %v1468_v7 = vadd.f32 0.5, %v1467_v41 }
0x226e   :  { %v1469_v48 = vmul.f32 %v1468_v7, %v1410_v9  ;;  %v2177_v9 = vld [vmem:[#allocation13 + $0x10] sm:$0xff]  }
0x22dc   :  { %v1472_v3 = vpop.permute.xlu1 %1471 }
0x22dd   :  { %v1474_v8 = vmul.f32 %v1472_v3, %v1468_v7 }
0x22df   :  { %1476 = vrot.lane.b32.xlu0 %v1474_v8, %s2426_s14 }
0x2351   :  { %v1477_v10 = vpop.permute.xlu0 %1476 }
0x2352   :  { %v1479_v11 = vadd.f32 %v1477_v10, %v1469_v48  ;;  %v1867_v10 = vld [vmem:[%s2949_s10] ss:$0 sm:$0xff]  ;;  %s2383_s10 = scalar_lea.vmem %s1802_s21, 128 }
0x2353   :  { %p2384_p6 = scmp.ne.s32.totalorder %s1802_s21, %s2383_s10  ;;  %p2389_p8 = scmp.lt.s32.totalorder %s2383_s10, %s2383_s10 }
0x2354   :  { %2237 = vtanh.f32 %v1479_v11 }
0x2355   :  { %p2390_p9 = por %p2389_p8, %p2388_p7 }
0x2357   :  { %p2391_p10 = pnand %p2390_p9, %p2384_p6 }
0x235e   :  { %v2238_v62 = vpop.eup %2237 }
0x235f   :  { %1482 = vrot.lane.b32.xlu1 %v2238_v62, %s2417_s29 }
0x23d1   :  { %v1483_v5 = vpop.permute.xlu1 %1482 }
0x23d2   :  { %v1485_v12 = vmul.f32 %v1483_v5, %v1468_v7 }
0x23d4   :  { %v1487_v50 = vpack.c.bf16 %v1485_v12, %v1485_v12 }
0x23d6   :  { %1489 = vrot.lane.b32.xlu0 %v1487_v50, %s2426_s14 }
0x2448   :  { %v1490_v13 = vpop.permute.xlu0 %1489 }
0x2449   :  { %2103 = vmatmul.mubr.msk.bf16.vlgmr.msra.gmra.mrb[40].mxu1 %vm323_vm2, %v1490_v13 }
0x244a   :  { %2118 = vmatprep.mubr.msk.bf16.mxu1 %vm2424_vm0, %v2423_v0  ;;  %2115 = vmatpush3.bf16.msra.mxu1 %v2173_v59 }
0x244b   :  { %2116 = vmatprep.subr.bf16.mxu1 %v2423_v0 }
0x244e   :  { %2117 = vmatpush3.bf16.msra.mxu1 %v2174_v61 }
0x251c   :  { %v1528_v15 = vpop.f32.mrb[40].mxu1 }
0x251d   :  { %v1534_v16 = vadd.f32 %v1528_v15, %v1053_v38  ;;  %v2104_v20 = vpop.f32.mrb[41].mxu1 }
0x251e   :  { %v1531_v21 = vpop.f32.mrb[42].mxu1 }
0x251f   :  { %2239 = vtanh.f32 %v1534_v16  ;;  %v2105_v22 = vpop.f32.mrb[43].mxu1 }
0x2529   :  { %v2240_v23 = vpop.eup %2239 }
0x252a   :  { %1540 = vrot.lane.b32.xlu1 %v2240_v23, %s2417_s29  ;;  %v1536_v24 = vmul.f32 0.5, %v2240_v23 }
0x252c   :  { %v1537_v25 = vadd.f32 0.5, %v1536_v24 }
0x252e   :  { %v1538_v28 = vmul.f32 %v1537_v25, %v1479_v11 }
0x259c   :  { %v1541_v26 = vpop.permute.xlu1 %1540 }
0x259d   :  { %v1543_v27 = vmul.f32 %v1541_v26, %v1537_v25 }
0x259f   :  { %1545 = vrot.lane.b32.xlu0 %v1543_v27, %s2426_s14 }
0x2611   :  { %v1546_v29 = vpop.permute.xlu0 %1545 }
0x2612   :  { %v1548_v30 = vadd.f32 %v1546_v29, %v1538_v28 }
0x2614   :  { %2241 = vtanh.f32 %v1548_v30 }
0x261e   :  { %v2242_v36 = vpop.eup %2241 }
0x261f   :  { %1551 = vrot.lane.b32.xlu1 %v2242_v36, %s2417_s29 }
0x2691   :  { %v1552_v31 = vpop.permute.xlu1 %1551 }
0x2692   :  { %v1554_v35 = vmul.f32 %v1552_v31, %v1537_v25 }
0x2694   :  { %v1556_v32 = vpack.c.bf16 %v1554_v35, %v1554_v35 }
0x2696   :  { %1558 = vrot.lane.b32.xlu0 %v1556_v32, %s2426_s14 }
0x2708   :  { %v1559_v52 = vpop.permute.xlu0 %1558 }
0x2709   :  { %2111 = vmatmul.mubr.msk.bf16.vlgmr.msra.gmra.mrb[32].mxu0 %vm323_vm2, %v1559_v52 }
0x270a   :  { %2138 = vmatprep.mubr.msk.bf16.mxu0 %vm2424_vm0, %v2423_v0  ;;  %2123 = vmatpush3.bf16.msra.mxu0 %v2175_v51 }
0x270b   :  { %2124 = vmatprep.subr.bf16.mxu0 %v2423_v0 }
0x270e   :  { %2125 = vmatpush3.bf16.msra.mxu0 %v2176_v53 }
0x270f   :  { %2126 = vmatprep.subr.bf16.mxu0 %v2423_v0 }
0x2712   :  { %2127 = vmatpush3.bf16.msra.mxu0 %v2177_v9 }
0x2713   :  { %2128 = vmatprep.subr.bf16.mxu0 %v2423_v0 }
0x2716   :  { %2129 = vmatpush3.bf16.msra.mxu0 %v2178_v56 }
0x2717   :  { %2130 = vmatprep.subr.bf16.mxu0 %v2423_v0 }
0x271a   :  { %2131 = vmatpush3.bf16.msra.mxu0 %v2179_v58 }
0x271b   :  { %2132 = vmatprep.subr.bf16.mxu0 %v2423_v0 }
0x271e   :  { %2133 = vmatpush3.bf16.msra.mxu0 %v2180_v63 }
0x271f   :  { %2134 = vmatprep.subr.bf16.mxu0 %v2423_v0 }
0x2722   :  { %2135 = vmatpush3.bf16.msra.mxu0 %v2181_v2 }
0x2723   :  { %2136 = vmatprep.subr.bf16.mxu0 %v2423_v0 }
0x2726   :  { %2137 = vmatpush3.bf16.msra.mxu0 %v2182_v4 }
0x27dc   :  { %v1597_v18 = vpop.f32.mrb[32].mxu0 }
0x27dd   :  { %v1603_v39 = vadd.f32 %v1597_v18, %v1056_v33  ;;  %v2112_v40 = vpop.f32.mrb[33].mxu0 }
0x27de   :  { %v1600_v60 = vpop.f32.mrb[34].mxu0 }
0x27df   :  { %2243 = vtanh.f32 %v1603_v39  ;;  %v2113_v42 = vpop.f32.mrb[35].mxu0 }
0x27e9   :  { %v2244_v34 = vpop.eup %2243 }
0x27ea   :  { %1609 = vrot.lane.b32.xlu1 %v2244_v34, %s2417_s29  ;;  %v1605_v17 = vmul.f32 0.5, %v2244_v34 }
0x27ec   :  { %v1606_v43 = vadd.f32 0.5, %v1605_v17 }
0x27ee   :  { %v1607_v46 = vmul.f32 %v1606_v43, %v1548_v30 }
0x285c   :  { %v1610_v44 = vpop.permute.xlu1 %1609 }
0x285d   :  { %v1612_v45 = vmul.f32 %v1610_v44, %v1606_v43 }
0x285f   :  { %1614 = vrot.lane.b32.xlu0 %v1612_v45, %s2426_s14 }
0x28d1   :  { %v1615_v47 = vpop.permute.xlu0 %1614 }
0x28d2   :  { %v1617_v57 = vadd.f32 %v1615_v47, %v1607_v46 }
0x28d4   :  { %2245 = vtanh.f32 %v1617_v57 }
0x28de   :  { %v2246_v49 = vpop.eup %2245 }
0x28df   :  { %1620 = vrot.lane.b32.xlu1 %v2246_v49, %s2417_s29 }
0x2951   :  { %v1621_v54 = vpop.permute.xlu1 %1620 }
0x2952   :  { %v1623_v55 = vmul.f32 %v1621_v54, %v1606_v43 }
0x2954   :  { %v1624_v19 = vpack.c.bf16 %v1623_v55, %v1623_v55 }
0x2956   :  { %1632 = vrot.lane.b32.xlu0 %v1624_v19, %s2426_s14 }
0x29c8   :  { %v1633_v1 = vpop.permute.xlu0 %1632 }
0x29c9   :  { %2119 = vmatmul.mubr.msk.bf16.vlgmr.msra.gmra.mrb[44].mxu1 %vm323_vm2, %v1633_v1 }
0x2a9c   :  { %v1683_v14 = vpop.f32.mrb[44].mxu1 }
0x2a9d   :  { %v1684_v37 = vadd.f32 %v1863_v6, %v1683_v14  ;;  %v2120_v41 = vpop.f32.mrb[45].mxu1 }
0x2a9e   :  { %v1686_v7 = vpop.f32.mrb[46].mxu1 }
0x2a9f   :  { %v1689_v3 = vmax.f32 %v1684_v37, 0.0  ;;  %v2121_v8 = vpop.f32.mrb[47].mxu1 }
0x2aa1   :  { %v1690_v48 = vpack.c.bf16 %v1689_v3, %v1689_v3 }
0x2aa3   :  { %2139 = vmatmul.mubr.bf16.vlgmr.msra.gmra.mrb[36].mxu0 %v1690_v48 }
0x2b76   :  { %v1779_v11 = vpop.f32.mrb[36].mxu0 }
0x2b77   :  { %v1780_v0 = vadd.f32 %v1867_v10, %v1779_v11  ;;  %v2140_v62 = vpop.f32.mrb[37].mxu0 }
0x2b78   :  { %v1782_v5 = vpop.f32.mrb[38].mxu0 }
0x2b79   :  { %1785 = vmax.xlane.f32.xlu1 %v1780_v0  ;;  %v2141_v12 = vpop.f32.mrb[39].mxu0 }
0x2c06   :  { %v1786_v50 = vpop.xlane.xlu1 %1785 }
0x2c07   :  { %v1787_v13 = vsub.f32 %v1780_v0, %v1786_v50 }
0x2c09   :  { %v1788_v38 = vmul.f32 1.442695, %v1787_v13 }
0x2c0b   :  { %2247 = vpow2.f32 %v1788_v38 }
0x2c15   :  { %v2248_v15 = vpop.eup %2247 }
0x2c16   :  { %1790 = vadd.xlane.f32.xlu0 %v2248_v15 }
0x2ca3   :  { %v1791_v16 = vpop.xlane.xlu0 %1790 }
0x2ca4   :  { %2249 = vrcp.f32 %v1791_v16 }
0x2cae   :  { %v2250_v20 = vpop.eup %2249 }
0x2caf   :  { %v1793_v21 = vmul.f32 %v2250_v20, %v2248_v15 }
0x2cb1   :  { %1794 = vst [vmem:[#allocation15] sm:$0xff] %v1793_v21 }
0x2cb2   :  { %2394 = shalt.err (!%p2391_p10)
}
0x2cb3   :  { %s2395_s27 = scalar_lea.hbm %s2950_s11, 128 }
0x2cb4   :  { %p2396_p11 = scmp.ne.s32.totalorder %s2950_s11, %s2395_s27  ;;  %p2399_p12 = scmp.lt.u32.totalorder %s2395_s27, %s2950_s11 }
0x2cb6   :  { %p2401_p13 = pnand %p2399_p12, %p2396_p11 }
0x2cb8   :  { %2404 = shalt.err (!%p2401_p13)
}
0x2cb9   :  { %1804 = dma.vmem_to_hbm [thread:$0]  %s1802_s21, 128, %s2950_s11, [#allocation6]  }
0x2cba   :  { %2413 = dma.done.wait [#allocation6], 128  }
0x2cbb   :  { %2414 = vsyncadd [#allocation6], 4294967168 }
0x2cbc   :  { %1808 = vsyncpa [#allocation5], 1 }
0x2cbd   :  { %1809 = vsyncpa [#allocation8], 1 }
0x2cbe   :  { %1810 = vsyncpa [#allocation11], 1 }
0x2cbf   :  { %1811 = vsyncpa [#allocation14], 1 }
0x2cc0   :  { %1812 = vsyncpa [#allocation6], 1 }

</bundles_post_ra>
